<compile_context>
chip_gen: v7x
topology: tpu7x:2x2x1
jax: 0.10.0
libtpu: 0.0.40
codegen_flags: <defaults>
</compile_context>

<pallas_src>
import functools
import math

import jax
import jax.numpy as jnp
from jax.experimental import pallas as pl
from jax.experimental.pallas import tpu as pltpu


def _flash_attn_kernel(q_ref, k_ref, v_ref, bias_ref,
                       wq_ref, wk_ref, wv_ref, wfc_ref, bfc_ref,
                       o_ref,
                       qp_ref, m_ref, l_ref, acc_ref,
                       *, heads, mxu_dtype):
    """Grid = (batch, kv_tiles). All heads + fc_out fused; online softmax."""
    H = heads
    E = q_ref.shape[2]
    D = E // H
    kv = pl.program_id(1)

    # ---- per-batch prologue: project Q once, reset accumulators ----------
    @pl.when(kv == 0)
    def _():
        # Softmax scale is already folded into wq (wrapper-side, in f32).
        qp_ref[...] = jnp.dot(q_ref[0].astype(mxu_dtype), wq_ref[...],
                              preferred_element_type=jnp.float32)
        m_ref[...] = jnp.full_like(m_ref, -jnp.inf)
        l_ref[...] = jnp.zeros_like(l_ref)
        acc_ref[...] = jnp.zeros_like(acc_ref)

    # ---- project this KV tile for all heads (lane-dense matmuls) ---------
    kp = jnp.dot(k_ref[0].astype(mxu_dtype), wk_ref[...],
                 preferred_element_type=jnp.float32)          # (tk, E)
    vp = jnp.dot(v_ref[0].astype(mxu_dtype), wv_ref[...],
                 preferred_element_type=jnp.float32)          # (tk, E)
    bias = bias_ref[0, 0]                 # (Lq, tk) additive mask, all heads

    # ---- online softmax; compile-time loop over heads ---------------------
    # TODO(synk): D=8 lane-wide head slices drive the MXU at a fraction of its
    # contraction/output width; fix operand shapes for realistic head_dim.
    for h in range(H):
        lo = h * D
        qh = qp_ref[:, lo:lo + D]                             # (Lq, D)
        kh = kp[:, lo:lo + D]                                 # (tk, D)
        vh = vp[:, lo:lo + D]                                 # (tk, D)

        # Q @ K^T without an in-kernel transpose.
        e = jax.lax.dot_general(qh.astype(mxu_dtype), kh.astype(mxu_dtype),
                                (((1,), (1,)), ((), ())),
                                preferred_element_type=jnp.float32)  # (Lq, tk)
        e = e + bias

        m_prev = m_ref[h]                                     # (Lq, 1)
        m_new = jnp.maximum(m_prev, jnp.max(e, axis=-1, keepdims=True))
        alpha = jnp.exp(m_prev - m_new)
        p = jnp.exp(e - m_new)
        l_ref[h] = alpha * l_ref[h] + jnp.sum(p, axis=-1, keepdims=True)
        acc_ref[:, lo:lo + D] = (
            alpha * acc_ref[:, lo:lo + D]
            + jnp.dot(p.astype(mxu_dtype), vh.astype(mxu_dtype),
                      preferred_element_type=jnp.float32))
        m_ref[h] = m_new

    # ---- finalize: normalize per head in scratch (no concat), then fc_out --
    @pl.when(kv == pl.num_programs(1) - 1)
    def _():
        for h in range(H):
            lo = h * D
            # TODO(synk): pl.reciprocal(..., approx=True) uses the EUP slot
            # (free) but can breach the 1e-4 test tolerance; enable if allowed.
            acc_ref[:, lo:lo + D] = (acc_ref[:, lo:lo + D]
                                     * pl.reciprocal(l_ref[h]))
        y = (jnp.dot(acc_ref[...].astype(mxu_dtype), wfc_ref[...],
                     preferred_element_type=jnp.float32) + bfc_ref[...])
        o_ref[0] = y.astype(o_ref.dtype)
        # TODO(synk): E=32 (<128 lanes) => masked partial stores; keep E a
        # multiple of 128 (or write a lane-dense slab) for real workloads.


def self_attention(values, keys, query, mask, params, *, heads,
                   kv_tile=None, mxu_dtype=jnp.float32):
    """Fused multi-head attention forward (projections + softmax + fc_out).

    mask: None, or anything broadcastable to (N, 1, Lq, Lk) (shared across
    heads, as in the reference usage).
    mxu_dtype: dtype of MXU operands. f32 matches the module's numerics
    exactly; bf16 roughly doubles MXU throughput and halves weight/K/V bytes.
    """
    N, Lq, E = query.shape
    Lk = keys.shape[1]
    H = heads

    if kv_tile is None:
        kv_tile = 512 if (Lk % 512 == 0) else Lk
    assert Lk % kv_tile == 0, "Lk must be divisible by kv_tile"
    n_kv = Lk // kv_tile

    # --- one-time weight prep (tiny, outside the kernel) ------------------
    # Per-head (D,D) Linear -> block-diagonal (E,E), transposed so the kernel
    # does one lane-dense x @ W per tensor.  The 1/sqrt(E) scale is folded
    # into the f32 Q weight BEFORE any dtype cast.
    # TODO(synk): at realistic E the kron inflates projection FLOPs/bytes by
    # H x; reshape x to (L*H, D) wrapper-side instead to keep original FLOPs.
    scale = 1.0 / math.sqrt(float(E))
    eye_h = jnp.eye(H, dtype=jnp.float32)
    wq_bd = jnp.kron(eye_h, (params["wq"] * scale).T).astype(mxu_dtype)
    wk_bd = jnp.kron(eye_h, params["wk"].T).astype(mxu_dtype)
    wv_bd = jnp.kron(eye_h, params["wv"].T).astype(mxu_dtype)
    wfc_t = params["w_fc"].T.astype(mxu_dtype)
    bfc = params["b_fc"].reshape(1, E).astype(jnp.float32)

    # Mask -> additive bias, NOT broadcast over heads (identical per head).
    # TODO(synk): per-head masks would need an (N, H, Lq, Lk) bias variant.
    if mask is None:
        bias = jnp.zeros((N, 1, Lq, Lk), jnp.float32)
    else:
        mask_b = jnp.broadcast_to(mask, (N, 1, Lq, Lk))
        bias = jnp.where(mask_b == 0, jnp.float32(-1e20), jnp.float32(0.0))

    kernel = functools.partial(_flash_attn_kernel, heads=H, mxu_dtype=mxu_dtype)

    return pl.pallas_call(
        kernel,
        out_shape=jax.ShapeDtypeStruct((N, Lq, E), jnp.float32),
        grid_spec=pltpu.PrefetchScalarGridSpec(
            num_scalar_prefetch=0,
            grid=(N, n_kv),
            in_specs=[
                pl.BlockSpec((1, Lq, E), lambda b, kv: (b, 0, 0)),           # q
                pl.BlockSpec((1, kv_tile, E), lambda b, kv: (b, kv, 0)),     # k
                pl.BlockSpec((1, kv_tile, E), lambda b, kv: (b, kv, 0)),     # v
                pl.BlockSpec((1, 1, Lq, kv_tile),
                             lambda b, kv: (b, 0, 0, kv)),                   # bias
                pl.BlockSpec((E, E), lambda b, kv: (0, 0)),                  # wq
                pl.BlockSpec((E, E), lambda b, kv: (0, 0)),                  # wk
                pl.BlockSpec((E, E), lambda b, kv: (0, 0)),                  # wv
                pl.BlockSpec((E, E), lambda b, kv: (0, 0)),                  # wfc
                pl.BlockSpec((1, E), lambda b, kv: (0, 0)),                  # bfc
            ],
            out_specs=pl.BlockSpec((1, Lq, E), lambda b, kv: (b, 0, 0)),
            scratch_shapes=[
                pltpu.VMEM((Lq, E), jnp.float32),      # projected Q (per batch)
                pltpu.VMEM((H, Lq, 1), jnp.float32),   # online-softmax max
                pltpu.VMEM((H, Lq, 1), jnp.float32),   # online-softmax denom
                pltpu.VMEM((Lq, E), jnp.float32),      # context accumulator
            ]),
        compiler_params=pltpu.CompilerParams(
            dimension_semantics=("parallel", "arbitrary"),
            vmem_limit_bytes=32 * 1024 * 1024),
    )(query, keys, values, bias, wq_bd, wk_bd, wv_bd, wfc_t, bfc)


def reference(values, keys, query, mask, params, *, heads):
    """Pure-JAX reference mirroring the PyTorch forward."""
    N, Lq, E = query.shape
    H = heads
    D = E // H
    v = values.reshape(N, -1, H, D)
    k = keys.reshape(N, -1, H, D)
    q = query.reshape(N, -1, H, D)
    v = jnp.einsum("nlhd,ed->nlhe", v, params["wv"])
    k = jnp.einsum("nlhd,ed->nlhe", k, params["wk"])
    q = jnp.einsum("nlhd,ed->nlhe", q, params["wq"])
    qT = q.transpose(0, 2, 1, 3)
    kT = k.transpose(0, 2, 1, 3)
    energy = jnp.matmul(qT, kT.transpose(0, 1, 3, 2))
    if mask is not None:
        energy = jnp.where(mask == 0, -1e20, energy)
    attn = jax.nn.softmax(energy / math.sqrt(E), axis=3)
    out = jnp.einsum("nhql,nlhd->nqhd", attn, v).reshape(N, Lq, H * D)
    return jnp.matmul(out, params["w_fc"].T) + params["b_fc"]


if __name__ == "__main__":
    # Small shapes consistent with the module: embed_size=32, heads=4 -> D=8.
    N, L, E, H = 2, 8, 32, 4
    D = E // H

    key = jax.random.PRNGKey(0)
    kq, kk, kv_, kwq, kwk, kwv, kwf, kbf = jax.random.split(key, 8)

    query = jax.random.normal(kq, (N, L, E), dtype=jnp.float32)
    keys_in = jax.random.normal(kk, (N, L, E), dtype=jnp.float32)
    values_in = jax.random.normal(kv_, (N, L, E), dtype=jnp.float32)

    # Causal mask shared across heads: (N, 1, Lq, Lk)
    mask = jnp.tril(jnp.ones((L, L), dtype=jnp.int32))[None, None].repeat(N, axis=0)

    def uinit(k, shape, fan_in):
        bound = 1.0 / math.sqrt(fan_in)
        return jax.random.uniform(k, shape, jnp.float32, -bound, bound)

    params = {
        "wq": uinit(kwq, (D, D), D),
        "wk": uinit(kwk, (D, D), D),
        "wv": uinit(kwv, (D, D), D),
        "w_fc": uinit(kwf, (E, E), E),
        "b_fc": uinit(kbf, (E,), E),
    }

    ref = reference(values_in, keys_in, query, mask, params, heads=H)

    # f32 MXU operands: matches the module's numerics at strict tolerance.
    out = self_attention(values_in, keys_in, query, mask, params, heads=H)
    out = jax.block_until_ready(out)
    assert out.shape == (N, L, E)
    assert jnp.allclose(out, ref, atol=1e-4, rtol=1e-4)

    # bf16 MXU operands (weights / K,V / attn probs): ~2x MXU throughput and
    # half the weight + K/V bytes on v5e/v6e/v7x; softmax/accumulation stay
    # f32, so only bf16 rounding separates it from the reference.
    out_bf16 = self_attention(values_in, keys_in, query, mask, params,
                              heads=H, mxu_dtype=jnp.bfloat16)
    out_bf16 = jax.block_until_ready(out_bf16)
    assert jnp.allclose(out_bf16, ref, atol=5e-2, rtol=5e-2)

    print("KERNEL_OK")
</pallas_src>

<mosaic_0001>
module attributes {stable_mosaic.version = 11 : i64} {
  func.func @_flash_attn_kernel(%arg0: i32, %arg1: i32, %arg2: memref<1x8x32xf32, #tpu.memory_space<vmem>>, %arg3: memref<1x8x32xf32, #tpu.memory_space<vmem>>, %arg4: memref<1x8x32xf32, #tpu.memory_space<vmem>>, %arg5: memref<1x1x8x8xf32, #tpu.memory_space<vmem>>, %arg6: memref<32x32xf32, #tpu.memory_space<vmem>>, %arg7: memref<32x32xf32, #tpu.memory_space<vmem>>, %arg8: memref<32x32xf32, #tpu.memory_space<vmem>>, %arg9: memref<32x32xf32, #tpu.memory_space<vmem>>, %arg10: memref<1x32xf32, #tpu.memory_space<vmem>>, %arg11: memref<1x8x32xf32, #tpu.memory_space<vmem>>, %arg12: memref<8x32xf32, #tpu.memory_space<vmem>>, %arg13: memref<4x8x1xf32, #tpu.memory_space<vmem>>, %arg14: memref<4x8x1xf32, #tpu.memory_space<vmem>>, %arg15: memref<8x32xf32, #tpu.memory_space<vmem>>) attributes {dimension_semantics = [#tpu.dimension_semantics<parallel>, #tpu.dimension_semantics<arbitrary>], iteration_bounds = array<i64: 2, 1>, scalar_prefetch = 0 : i64, scratch_operands = 4 : i64, tpu.core_type = #tpu.core_type<tc>, window_params = [{transform_indices = @transform_0, window_bounds = array<i64: 1, 8, 32>}, {transform_indices = @transform_1, window_bounds = array<i64: 1, 8, 32>}, {transform_indices = @transform_2, window_bounds = array<i64: 1, 8, 32>}, {transform_indices = @transform_3, window_bounds = array<i64: 1, 1, 8, 8>}, {pipeline_mode = #tpu.pipeline_mode<synchronous>, transform_indices = @transform_4, window_bounds = array<i64: 32, 32>}, {pipeline_mode = #tpu.pipeline_mode<synchronous>, transform_indices = @transform_5, window_bounds = array<i64: 32, 32>}, {pipeline_mode = #tpu.pipeline_mode<synchronous>, transform_indices = @transform_6, window_bounds = array<i64: 32, 32>}, {pipeline_mode = #tpu.pipeline_mode<synchronous>, transform_indices = @transform_7, window_bounds = array<i64: 32, 32>}, {pipeline_mode = #tpu.pipeline_mode<synchronous>, transform_indices = @transform_8, window_bounds = array<i64: 1, 32>}, {transform_indices = @transform_9, window_bounds = array<i64: 1, 8, 32>}]} {
    %c0_i32 = arith.constant 0 : i32
    %0 = arith.cmpi eq, %arg1, %c0_i32 : i32
    %1 = arith.extui %0 : i1 to i32
    %c0_i32_0 = arith.constant 0 : i32
    %2 = arith.cmpi ne, %1, %c0_i32_0 : i32
    scf.if %2 {
      %c0_99 = arith.constant 0 : index
      %c0_100 = arith.constant 0 : index
      %c0_101 = arith.constant 0 : index
      %148 = vector.load %arg2[%c0_99, %c0_100, %c0_101] : memref<1x8x32xf32, #tpu.memory_space<vmem>>, vector<1x8x32xf32>
      %149 = vector.shape_cast %148 : vector<1x8x32xf32> to vector<8x32xf32>
      %c0_102 = arith.constant 0 : index
      %c0_103 = arith.constant 0 : index
      %150 = vector.load %arg6[%c0_102, %c0_103] : memref<32x32xf32, #tpu.memory_space<vmem>>, vector<32x32xf32>
      %cst_104 = arith.constant dense<0.000000e+00> : vector<8x32xf32>
      %151 = tpu.matmul %149, %150, %cst_104 {dimension_numbers = #tpu.dot_dimension_numbers<[1], [0], [0], [1], [0, 0, 1, 1], [], []>} : vector<8x32xf32>, vector<32x32xf32>, vector<8x32xf32> -> vector<8x32xf32>
      %c0_105 = arith.constant 0 : index
      %c0_106 = arith.constant 0 : index
      %152 = vector.load %arg12[%c0_105, %c0_106] : memref<8x32xf32, #tpu.memory_space<vmem>>, vector<8x32xf32>
      tpu.vector_store %arg12[%c0_105, %c0_106], %151 {strides = array<i32>} : memref<8x32xf32, #tpu.memory_space<vmem>>, vector<8x32xf32>,
      %cst_107 = arith.constant 0xFF800000 : f32
      %153 = vector.broadcast %cst_107 : f32 to vector<4x8x1xf32>
      %c0_108 = arith.constant 0 : index
      %c0_109 = arith.constant 0 : index
      %c0_110 = arith.constant 0 : index
      %154 = vector.load %arg13[%c0_108, %c0_109, %c0_110] : memref<4x8x1xf32, #tpu.memory_space<vmem>>, vector<4x8x1xf32>
      tpu.vector_store %arg13[%c0_108, %c0_109, %c0_110], %153 {strides = array<i32>} : memref<4x8x1xf32, #tpu.memory_space<vmem>>, vector<4x8x1xf32>,
      %cst_111 = arith.constant 0.000000e+00 : f32
      %155 = vector.broadcast %cst_111 : f32 to vector<4x8x1xf32>
      %c0_112 = arith.constant 0 : index
      %c0_113 = arith.constant 0 : index
      %c0_114 = arith.constant 0 : index
      %156 = vector.load %arg14[%c0_112, %c0_113, %c0_114] : memref<4x8x1xf32, #tpu.memory_space<vmem>>, vector<4x8x1xf32>
      tpu.vector_store %arg14[%c0_112, %c0_113, %c0_114], %155 {strides = array<i32>} : memref<4x8x1xf32, #tpu.memory_space<vmem>>, vector<4x8x1xf32>,
      %cst_115 = arith.constant 0.000000e+00 : f32
      %157 = vector.broadcast %cst_115 : f32 to vector<8x32xf32>
      %c0_116 = arith.constant 0 : index
      %c0_117 = arith.constant 0 : index
      %158 = vector.load %arg15[%c0_116, %c0_117] : memref<8x32xf32, #tpu.memory_space<vmem>>, vector<8x32xf32>
      tpu.vector_store %arg15[%c0_116, %c0_117], %157 {strides = array<i32>} : memref<8x32xf32, #tpu.memory_space<vmem>>, vector<8x32xf32>,
    } else {
    }
    %c0 = arith.constant 0 : index
    %c0_1 = arith.constant 0 : index
    %c0_2 = arith.constant 0 : index
    %3 = vector.load %arg3[%c0, %c0_1, %c0_2] : memref<1x8x32xf32, #tpu.memory_space<vmem>>, vector<1x8x32xf32>
    %4 = vector.shape_cast %3 : vector<1x8x32xf32> to vector<8x32xf32>
    %c0_3 = arith.constant 0 : index
    %c0_4 = arith.constant 0 : index
    %5 = vector.load %arg7[%c0_3, %c0_4] : memref<32x32xf32, #tpu.memory_space<vmem>>, vector<32x32xf32>
    %cst = arith.constant dense<0.000000e+00> : vector<8x32xf32>
    %6 = tpu.matmul %4, %5, %cst {dimension_numbers = #tpu.dot_dimension_numbers<[1], [0], [0], [1], [0, 0, 1, 1], [], []>} : vector<8x32xf32>, vector<32x32xf32>, vector<8x32xf32> -> vector<8x32xf32>
    %c0_5 = arith.constant 0 : index
    %c0_6 = arith.constant 0 : index
    %c0_7 = arith.constant 0 : index
    %7 = vector.load %arg4[%c0_5, %c0_6, %c0_7] : memref<1x8x32xf32, #tpu.memory_space<vmem>>, vector<1x8x32xf32>
    %8 = vector.shape_cast %7 : vector<1x8x32xf32> to vector<8x32xf32>
    %c0_8 = arith.constant 0 : index
    %c0_9 = arith.constant 0 : index
    %9 = vector.load %arg8[%c0_8, %c0_9] : memref<32x32xf32, #tpu.memory_space<vmem>>, vector<32x32xf32>
    %cst_10 = arith.constant dense<0.000000e+00> : vector<8x32xf32>
    %10 = tpu.matmul %8, %9, %cst_10 {dimension_numbers = #tpu.dot_dimension_numbers<[1], [0], [0], [1], [0, 0, 1, 1], [], []>} : vector<8x32xf32>, vector<32x32xf32>, vector<8x32xf32> -> vector<8x32xf32>
    %c0_11 = arith.constant 0 : index
    %c0_12 = arith.constant 0 : index
    %c0_13 = arith.constant 0 : index
    %c0_14 = arith.constant 0 : index
    %11 = vector.load %arg5[%c0_11, %c0_12, %c0_13, %c0_14] : memref<1x1x8x8xf32, #tpu.memory_space<vmem>>, vector<1x1x8x8xf32>
    %12 = vector.shape_cast %11 : vector<1x1x8x8xf32> to vector<8x8xf32>
    %c0_15 = arith.constant 0 : index
    %c0_16 = arith.constant 0 : index
    %13 = vector.load %arg12[%c0_15, %c0_16] : memref<8x32xf32, #tpu.memory_space<vmem>>, vector<8x8xf32>
    %14 = vector.extract_strided_slice %6 {offsets = [0, 0], sizes = [8, 8], strides = [1, 1]} : vector<8x32xf32> to vector<8x8xf32>
    %15 = vector.extract_strided_slice %10 {offsets = [0, 0], sizes = [8, 8], strides = [1, 1]} : vector<8x32xf32> to vector<8x8xf32>
    %cst_17 = arith.constant dense<0.000000e+00> : vector<8x8xf32>
    %16 = tpu.matmul %13, %14, %cst_17 {dimension_numbers = #tpu.dot_dimension_numbers<[1], [1], [0], [0], [0, 0, 1, 0], [], []>} : vector<8x8xf32>, vector<8x8xf32>, vector<8x8xf32> -> vector<8x8xf32>
    %17 = arith.addf %16, %12 : vector<8x8xf32>
    %c0_18 = arith.constant 0 : index
    %c0_19 = arith.constant 0 : index
    %c0_20 = arith.constant 0 : index
    %18 = vector.load %arg13[%c0_18, %c0_19, %c0_20] : memref<4x8x1xf32, #tpu.memory_space<vmem>>, vector<1x8x1xf32>
    %19 = vector.shape_cast %18 : vector<1x8x1xf32> to vector<8x1xf32>
    %cst_21 = arith.constant dense<0xFF800000> : vector<8xf32>
    %20 = vector.multi_reduction <maximumf>, %17, %cst_21 [1] : vector<8x8xf32> to vector<8xf32>
    %21 = vector.shape_cast %20 : vector<8xf32> to vector<8x1xf32>
    %22 = arith.maximumf %19, %21 : vector<8x1xf32>
    %23 = arith.subf %19, %22 : vector<8x1xf32>
    %24 = math.exp %23 : vector<8x1xf32>
    %25 = vector.broadcast %22 : vector<8x1xf32> to vector<8x8xf32>
    %26 = arith.subf %17, %25 : vector<8x8xf32>
    %27 = math.exp %26 : vector<8x8xf32>
    %c0_22 = arith.constant 0 : index
    %c0_23 = arith.constant 0 : index
    %c0_24 = arith.constant 0 : index
    %28 = vector.load %arg14[%c0_22, %c0_23, %c0_24] : memref<4x8x1xf32, #tpu.memory_space<vmem>>, vector<1x8x1xf32>
    %29 = vector.shape_cast %28 : vector<1x8x1xf32> to vector<8x1xf32>
    %30 = arith.mulf %24, %29 : vector<8x1xf32>
    %cst_25 = arith.constant dense<0.000000e+00> : vector<8xf32>
    %31 = vector.multi_reduction <add>, %27, %cst_25 [1] : vector<8x8xf32> to vector<8xf32>
    %32 = vector.shape_cast %31 : vector<8xf32> to vector<8x1xf32>
    %33 = arith.addf %30, %32 : vector<8x1xf32>
    %c0_26 = arith.constant 0 : index
    %c0_27 = arith.constant 0 : index
    %c0_28 = arith.constant 0 : index
    %34 = vector.load %arg14[%c0_26, %c0_27, %c0_28] : memref<4x8x1xf32, #tpu.memory_space<vmem>>, vector<1x8x1xf32>
    %35 = vector.shape_cast %34 : vector<1x8x1xf32> to vector<8x1xf32>
    %36 = vector.shape_cast %33 : vector<8x1xf32> to vector<1x8x1xf32>
    tpu.vector_store %arg14[%c0_26, %c0_27, %c0_28], %36 {strides = array<i32>} : memref<4x8x1xf32, #tpu.memory_space<vmem>>, vector<1x8x1xf32>,
    %c0_29 = arith.constant 0 : index
    %c0_30 = arith.constant 0 : index
    %37 = vector.load %arg15[%c0_29, %c0_30] : memref<8x32xf32, #tpu.memory_space<vmem>>, vector<8x8xf32>
    %38 = vector.broadcast %24 : vector<8x1xf32> to vector<8x8xf32>
    %39 = arith.mulf %38, %37 : vector<8x8xf32>
    %cst_31 = arith.constant dense<0.000000e+00> : vector<8x8xf32>
    %40 = tpu.matmul %27, %15, %cst_31 {dimension_numbers = #tpu.dot_dimension_numbers<[1], [0], [0], [1], [0, 0, 1, 1], [], []>} : vector<8x8xf32>, vector<8x8xf32>, vector<8x8xf32> -> vector<8x8xf32>
    %41 = arith.addf %39, %40 : vector<8x8xf32>
    %c0_32 = arith.constant 0 : index
    %c0_33 = arith.constant 0 : index
    %42 = vector.load %arg15[%c0_32, %c0_33] : memref<8x32xf32, #tpu.memory_space<vmem>>, vector<8x8xf32>
    tpu.vector_store %arg15[%c0_32, %c0_33], %41 {strides = array<i32>} : memref<8x32xf32, #tpu.memory_space<vmem>>, vector<8x8xf32>,
    %c0_34 = arith.constant 0 : index
    %c0_35 = arith.constant 0 : index
    %c0_36 = arith.constant 0 : index
    %43 = vector.load %arg13[%c0_34, %c0_35, %c0_36] : memref<4x8x1xf32, #tpu.memory_space<vmem>>, vector<1x8x1xf32>
    %44 = vector.shape_cast %43 : vector<1x8x1xf32> to vector<8x1xf32>
    %45 = vector.shape_cast %22 : vector<8x1xf32> to vector<1x8x1xf32>
    tpu.vector_store %arg13[%c0_34, %c0_35, %c0_36], %45 {strides = array<i32>} : memref<4x8x1xf32, #tpu.memory_space<vmem>>, vector<1x8x1xf32>,
    %c0_37 = arith.constant 0 : index
    %c8 = arith.constant 8 : index
    %46 = vector.load %arg12[%c0_37, %c8] : memref<8x32xf32, #tpu.memory_space<vmem>>, vector<8x8xf32>
    %47 = vector.extract_strided_slice %6 {offsets = [0, 8], sizes = [8, 8], strides = [1, 1]} : vector<8x32xf32> to vector<8x8xf32>
    %48 = vector.extract_strided_slice %10 {offsets = [0, 8], sizes = [8, 8], strides = [1, 1]} : vector<8x32xf32> to vector<8x8xf32>
    %cst_38 = arith.constant dense<0.000000e+00> : vector<8x8xf32>
    %49 = tpu.matmul %46, %47, %cst_38 {dimension_numbers = #tpu.dot_dimension_numbers<[1], [1], [0], [0], [0, 0, 1, 0], [], []>} : vector<8x8xf32>, vector<8x8xf32>, vector<8x8xf32> -> vector<8x8xf32>
    %50 = arith.addf %49, %12 : vector<8x8xf32>
    %c1 = arith.constant 1 : index
    %c0_39 = arith.constant 0 : index
    %c0_40 = arith.constant 0 : index
    %51 = vector.load %arg13[%c1, %c0_39, %c0_40] : memref<4x8x1xf32, #tpu.memory_space<vmem>>, vector<1x8x1xf32>
    %52 = vector.shape_cast %51 : vector<1x8x1xf32> to vector<8x1xf32>
    %cst_41 = arith.constant dense<0xFF800000> : vector<8xf32>
    %53 = vector.multi_reduction <maximumf>, %50, %cst_41 [1] : vector<8x8xf32> to vector<8xf32>
    %54 = vector.shape_cast %53 : vector<8xf32> to vector<8x1xf32>
    %55 = arith.maximumf %52, %54 : vector<8x1xf32>
    %56 = arith.subf %52, %55 : vector<8x1xf32>
    %57 = math.exp %56 : vector<8x1xf32>
    %58 = vector.broadcast %55 : vector<8x1xf32> to vector<8x8xf32>
    %59 = arith.subf %50, %58 : vector<8x8xf32>
    %60 = math.exp %59 : vector<8x8xf32>
    %c1_42 = arith.constant 1 : index
    %c0_43 = arith.constant 0 : index
    %c0_44 = arith.constant 0 : index
    %61 = vector.load %arg14[%c1_42, %c0_43, %c0_44] : memref<4x8x1xf32, #tpu.memory_space<vmem>>, vector<1x8x1xf32>
    %62 = vector.shape_cast %61 : vector<1x8x1xf32> to vector<8x1xf32>
    %63 = arith.mulf %57, %62 : vector<8x1xf32>
    %cst_45 = arith.constant dense<0.000000e+00> : vector<8xf32>
    %64 = vector.multi_reduction <add>, %60, %cst_45 [1] : vector<8x8xf32> to vector<8xf32>
    %65 = vector.shape_cast %64 : vector<8xf32> to vector<8x1xf32>
    %66 = arith.addf %63, %65 : vector<8x1xf32>
    %c1_46 = arith.constant 1 : index
    %c0_47 = arith.constant 0 : index
    %c0_48 = arith.constant 0 : index
    %67 = vector.load %arg14[%c1_46, %c0_47, %c0_48] : memref<4x8x1xf32, #tpu.memory_space<vmem>>, vector<1x8x1xf32>
    %68 = vector.shape_cast %67 : vector<1x8x1xf32> to vector<8x1xf32>
    %69 = vector.shape_cast %66 : vector<8x1xf32> to vector<1x8x1xf32>
    tpu.vector_store %arg14[%c1_46, %c0_47, %c0_48], %69 {strides = array<i32>} : memref<4x8x1xf32, #tpu.memory_space<vmem>>, vector<1x8x1xf32>,
    %c0_49 = arith.constant 0 : index
    %c8_50 = arith.constant 8 : index
    %70 = vector.load %arg15[%c0_49, %c8_50] : memref<8x32xf32, #tpu.memory_space<vmem>>, vector<8x8xf32>
    %71 = vector.broadcast %57 : vector<8x1xf32> to vector<8x8xf32>
    %72 = arith.mulf %71, %70 : vector<8x8xf32>
    %cst_51 = arith.constant dense<0.000000e+00> : vector<8x8xf32>
    %73 = tpu.matmul %60, %48, %cst_51 {dimension_numbers = #tpu.dot_dimension_numbers<[1], [0], [0], [1], [0, 0, 1, 1], [], []>} : vector<8x8xf32>, vector<8x8xf32>, vector<8x8xf32> -> vector<8x8xf32>
    %74 = arith.addf %72, %73 : vector<8x8xf32>
    %c0_52 = arith.constant 0 : index
    %c8_53 = arith.constant 8 : index
    %75 = vector.load %arg15[%c0_52, %c8_53] : memref<8x32xf32, #tpu.memory_space<vmem>>, vector<8x8xf32>
    tpu.vector_store %arg15[%c0_52, %c8_53], %74 {strides = array<i32>} : memref<8x32xf32, #tpu.memory_space<vmem>>, vector<8x8xf32>,
    %c1_54 = arith.constant 1 : index
    %c0_55 = arith.constant 0 : index
    %c0_56 = arith.constant 0 : index
    %76 = vector.load %arg13[%c1_54, %c0_55, %c0_56] : memref<4x8x1xf32, #tpu.memory_space<vmem>>, vector<1x8x1xf32>
    %77 = vector.shape_cast %76 : vector<1x8x1xf32> to vector<8x1xf32>
    %78 = vector.shape_cast %55 : vector<8x1xf32> to vector<1x8x1xf32>
    tpu.vector_store %arg13[%c1_54, %c0_55, %c0_56], %78 {strides = array<i32>} : memref<4x8x1xf32, #tpu.memory_space<vmem>>, vector<1x8x1xf32>,
    %c0_57 = arith.constant 0 : index
    %c16 = arith.constant 16 : index
    %79 = vector.load %arg12[%c0_57, %c16] : memref<8x32xf32, #tpu.memory_space<vmem>>, vector<8x8xf32>
    %80 = vector.extract_strided_slice %6 {offsets = [0, 16], sizes = [8, 8], strides = [1, 1]} : vector<8x32xf32> to vector<8x8xf32>
    %81 = vector.extract_strided_slice %10 {offsets = [0, 16], sizes = [8, 8], strides = [1, 1]} : vector<8x32xf32> to vector<8x8xf32>
    %cst_58 = arith.constant dense<0.000000e+00> : vector<8x8xf32>
    %82 = tpu.matmul %79, %80, %cst_58 {dimension_numbers = #tpu.dot_dimension_numbers<[1], [1], [0], [0], [0, 0, 1, 0], [], []>} : vector<8x8xf32>, vector<8x8xf32>, vector<8x8xf32> -> vector<8x8xf32>
    %83 = arith.addf %82, %12 : vector<8x8xf32>
    %c2 = arith.constant 2 : index
    %c0_59 = arith.constant 0 : index
    %c0_60 = arith.constant 0 : index
    %84 = vector.load %arg13[%c2, %c0_59, %c0_60] : memref<4x8x1xf32, #tpu.memory_space<vmem>>, vector<1x8x1xf32>
    %85 = vector.shape_cast %84 : vector<1x8x1xf32> to vector<8x1xf32>
    %cst_61 = arith.constant dense<0xFF800000> : vector<8xf32>
    %86 = vector.multi_reduction <maximumf>, %83, %cst_61 [1] : vector<8x8xf32> to vector<8xf32>
    %87 = vector.shape_cast %86 : vector<8xf32> to vector<8x1xf32>
    %88 = arith.maximumf %85, %87 : vector<8x1xf32>
    %89 = arith.subf %85, %88 : vector<8x1xf32>
    %90 = math.exp %89 : vector<8x1xf32>
    %91 = vector.broadcast %88 : vector<8x1xf32> to vector<8x8xf32>
    %92 = arith.subf %83, %91 : vector<8x8xf32>
    %93 = math.exp %92 : vector<8x8xf32>
    %c2_62 = arith.constant 2 : index
    %c0_63 = arith.constant 0 : index
    %c0_64 = arith.constant 0 : index
    %94 = vector.load %arg14[%c2_62, %c0_63, %c0_64] : memref<4x8x1xf32, #tpu.memory_space<vmem>>, vector<1x8x1xf32>
    %95 = vector.shape_cast %94 : vector<1x8x1xf32> to vector<8x1xf32>
    %96 = arith.mulf %90, %95 : vector<8x1xf32>
    %cst_65 = arith.constant dense<0.000000e+00> : vector<8xf32>
    %97 = vector.multi_reduction <add>, %93, %cst_65 [1] : vector<8x8xf32> to vector<8xf32>
    %98 = vector.shape_cast %97 : vector<8xf32> to vector<8x1xf32>
    %99 = arith.addf %96, %98 : vector<8x1xf32>
    %c2_66 = arith.constant 2 : index
    %c0_67 = arith.constant 0 : index
    %c0_68 = arith.constant 0 : index
    %100 = vector.load %arg14[%c2_66, %c0_67, %c0_68] : memref<4x8x1xf32, #tpu.memory_space<vmem>>, vector<1x8x1xf32>
    %101 = vector.shape_cast %100 : vector<1x8x1xf32> to vector<8x1xf32>
    %102 = vector.shape_cast %99 : vector<8x1xf32> to vector<1x8x1xf32>
    tpu.vector_store %arg14[%c2_66, %c0_67, %c0_68], %102 {strides = array<i32>} : memref<4x8x1xf32, #tpu.memory_space<vmem>>, vector<1x8x1xf32>,
    %c0_69 = arith.constant 0 : index
    %c16_70 = arith.constant 16 : index
    %103 = vector.load %arg15[%c0_69, %c16_70] : memref<8x32xf32, #tpu.memory_space<vmem>>, vector<8x8xf32>
    %104 = vector.broadcast %90 : vector<8x1xf32> to vector<8x8xf32>
    %105 = arith.mulf %104, %103 : vector<8x8xf32>
    %cst_71 = arith.constant dense<0.000000e+00> : vector<8x8xf32>
    %106 = tpu.matmul %93, %81, %cst_71 {dimension_numbers = #tpu.dot_dimension_numbers<[1], [0], [0], [1], [0, 0, 1, 1], [], []>} : vector<8x8xf32>, vector<8x8xf32>, vector<8x8xf32> -> vector<8x8xf32>
    %107 = arith.addf %105, %106 : vector<8x8xf32>
    %c0_72 = arith.constant 0 : index
    %c16_73 = arith.constant 16 : index
    %108 = vector.load %arg15[%c0_72, %c16_73] : memref<8x32xf32, #tpu.memory_space<vmem>>, vector<8x8xf32>
    tpu.vector_store %arg15[%c0_72, %c16_73], %107 {strides = array<i32>} : memref<8x32xf32, #tpu.memory_space<vmem>>, vector<8x8xf32>,
    %c2_74 = arith.constant 2 : index
    %c0_75 = arith.constant 0 : index
    %c0_76 = arith.constant 0 : index
    %109 = vector.load %arg13[%c2_74, %c0_75, %c0_76] : memref<4x8x1xf32, #tpu.memory_space<vmem>>, vector<1x8x1xf32>
    %110 = vector.shape_cast %109 : vector<1x8x1xf32> to vector<8x1xf32>
    %111 = vector.shape_cast %88 : vector<8x1xf32> to vector<1x8x1xf32>
    tpu.vector_store %arg13[%c2_74, %c0_75, %c0_76], %111 {strides = array<i32>} : memref<4x8x1xf32, #tpu.memory_space<vmem>>, vector<1x8x1xf32>,
    %c0_77 = arith.constant 0 : index
    %c24 = arith.constant 24 : index
    %112 = vector.load %arg12[%c0_77, %c24] : memref<8x32xf32, #tpu.memory_space<vmem>>, vector<8x8xf32>
    %113 = vector.extract_strided_slice %6 {offsets = [0, 24], sizes = [8, 8], strides = [1, 1]} : vector<8x32xf32> to vector<8x8xf32>
    %114 = vector.extract_strided_slice %10 {offsets = [0, 24], sizes = [8, 8], strides = [1, 1]} : vector<8x32xf32> to vector<8x8xf32>
    %cst_78 = arith.constant dense<0.000000e+00> : vector<8x8xf32>
    %115 = tpu.matmul %112, %113, %cst_78 {dimension_numbers = #tpu.dot_dimension_numbers<[1], [1], [0], [0], [0, 0, 1, 0], [], []>} : vector<8x8xf32>, vector<8x8xf32>, vector<8x8xf32> -> vector<8x8xf32>
    %116 = arith.addf %115, %12 : vector<8x8xf32>
    %c3 = arith.constant 3 : index
    %c0_79 = arith.constant 0 : index
    %c0_80 = arith.constant 0 : index
    %117 = vector.load %arg13[%c3, %c0_79, %c0_80] : memref<4x8x1xf32, #tpu.memory_space<vmem>>, vector<1x8x1xf32>
    %118 = vector.shape_cast %117 : vector<1x8x1xf32> to vector<8x1xf32>
    %cst_81 = arith.constant dense<0xFF800000> : vector<8xf32>
    %119 = vector.multi_reduction <maximumf>, %116, %cst_81 [1] : vector<8x8xf32> to vector<8xf32>
    %120 = vector.shape_cast %119 : vector<8xf32> to vector<8x1xf32>
    %121 = arith.maximumf %118, %120 : vector<8x1xf32>
    %122 = arith.subf %118, %121 : vector<8x1xf32>
    %123 = math.exp %122 : vector<8x1xf32>
    %124 = vector.broadcast %121 : vector<8x1xf32> to vector<8x8xf32>
    %125 = arith.subf %116, %124 : vector<8x8xf32>
    %126 = math.exp %125 : vector<8x8xf32>
    %c3_82 = arith.constant 3 : index
    %c0_83 = arith.constant 0 : index
    %c0_84 = arith.constant 0 : index
    %127 = vector.load %arg14[%c3_82, %c0_83, %c0_84] : memref<4x8x1xf32, #tpu.memory_space<vmem>>, vector<1x8x1xf32>
    %128 = vector.shape_cast %127 : vector<1x8x1xf32> to vector<8x1xf32>
    %129 = arith.mulf %123, %128 : vector<8x1xf32>
    %cst_85 = arith.constant dense<0.000000e+00> : vector<8xf32>
    %130 = vector.multi_reduction <add>, %126, %cst_85 [1] : vector<8x8xf32> to vector<8xf32>
    %131 = vector.shape_cast %130 : vector<8xf32> to vector<8x1xf32>
    %132 = arith.addf %129, %131 : vector<8x1xf32>
    %c3_86 = arith.constant 3 : index
    %c0_87 = arith.constant 0 : index
    %c0_88 = arith.constant 0 : index
    %133 = vector.load %arg14[%c3_86, %c0_87, %c0_88] : memref<4x8x1xf32, #tpu.memory_space<vmem>>, vector<1x8x1xf32>
    %134 = vector.shape_cast %133 : vector<1x8x1xf32> to vector<8x1xf32>
    %135 = vector.shape_cast %132 : vector<8x1xf32> to vector<1x8x1xf32>
    tpu.vector_store %arg14[%c3_86, %c0_87, %c0_88], %135 {strides = array<i32>} : memref<4x8x1xf32, #tpu.memory_space<vmem>>, vector<1x8x1xf32>,
    %c0_89 = arith.constant 0 : index
    %c24_90 = arith.constant 24 : index
    %136 = vector.load %arg15[%c0_89, %c24_90] : memref<8x32xf32, #tpu.memory_space<vmem>>, vector<8x8xf32>
    %137 = vector.broadcast %123 : vector<8x1xf32> to vector<8x8xf32>
    %138 = arith.mulf %137, %136 : vector<8x8xf32>
    %cst_91 = arith.constant dense<0.000000e+00> : vector<8x8xf32>
    %139 = tpu.matmul %126, %114, %cst_91 {dimension_numbers = #tpu.dot_dimension_numbers<[1], [0], [0], [1], [0, 0, 1, 1], [], []>} : vector<8x8xf32>, vector<8x8xf32>, vector<8x8xf32> -> vector<8x8xf32>
    %140 = arith.addf %138, %139 : vector<8x8xf32>
    %c0_92 = arith.constant 0 : index
    %c24_93 = arith.constant 24 : index
    %141 = vector.load %arg15[%c0_92, %c24_93] : memref<8x32xf32, #tpu.memory_space<vmem>>, vector<8x8xf32>
    tpu.vector_store %arg15[%c0_92, %c24_93], %140 {strides = array<i32>} : memref<8x32xf32, #tpu.memory_space<vmem>>, vector<8x8xf32>,
    %c3_94 = arith.constant 3 : index
    %c0_95 = arith.constant 0 : index
    %c0_96 = arith.constant 0 : index
    %142 = vector.load %arg13[%c3_94, %c0_95, %c0_96] : memref<4x8x1xf32, #tpu.memory_space<vmem>>, vector<1x8x1xf32>
    %143 = vector.shape_cast %142 : vector<1x8x1xf32> to vector<8x1xf32>
    %144 = vector.shape_cast %121 : vector<8x1xf32> to vector<1x8x1xf32>
    tpu.vector_store %arg13[%c3_94, %c0_95, %c0_96], %144 {strides = array<i32>} : memref<4x8x1xf32, #tpu.memory_space<vmem>>, vector<1x8x1xf32>,
    %c0_i32_97 = arith.constant 0 : i32
    %145 = arith.cmpi eq, %arg1, %c0_i32_97 : i32
    %146 = arith.extui %145 : i1 to i32
    %c0_i32_98 = arith.constant 0 : i32
    %147 = arith.cmpi ne, %146, %c0_i32_98 : i32
    scf.if %147 {
      %c0_99 = arith.constant 0 : index
      %c0_100 = arith.constant 0 : index
      %148 = vector.load %arg15[%c0_99, %c0_100] : memref<8x32xf32, #tpu.memory_space<vmem>>, vector<8x8xf32>
      %c0_101 = arith.constant 0 : index
      %c0_102 = arith.constant 0 : index
      %c0_103 = arith.constant 0 : index
      %149 = vector.load %arg14[%c0_101, %c0_102, %c0_103] : memref<4x8x1xf32, #tpu.memory_space<vmem>>, vector<1x8x1xf32>
      %150 = vector.shape_cast %149 : vector<1x8x1xf32> to vector<8x1xf32>
      %151 = tpu.reciprocal %150 : vector<8x1xf32> -> vector<8x1xf32>
      %152 = vector.broadcast %151 : vector<8x1xf32> to vector<8x8xf32>
      %153 = arith.mulf %148, %152 : vector<8x8xf32>
      %c0_104 = arith.constant 0 : index
      %c0_105 = arith.constant 0 : index
      %154 = vector.load %arg15[%c0_104, %c0_105] : memref<8x32xf32, #tpu.memory_space<vmem>>, vector<8x8xf32>
      tpu.vector_store %arg15[%c0_104, %c0_105], %153 {strides = array<i32>} : memref<8x32xf32, #tpu.memory_space<vmem>>, vector<8x8xf32>,
      %c0_106 = arith.constant 0 : index
      %c8_107 = arith.constant 8 : index
      %155 = vector.load %arg15[%c0_106, %c8_107] : memref<8x32xf32, #tpu.memory_space<vmem>>, vector<8x8xf32>
      %c1_108 = arith.constant 1 : index
      %c0_109 = arith.constant 0 : index
      %c0_110 = arith.constant 0 : index
      %156 = vector.load %arg14[%c1_108, %c0_109, %c0_110] : memref<4x8x1xf32, #tpu.memory_space<vmem>>, vector<1x8x1xf32>
      %157 = vector.shape_cast %156 : vector<1x8x1xf32> to vector<8x1xf32>
      %158 = tpu.reciprocal %157 : vector<8x1xf32> -> vector<8x1xf32>
      %159 = vector.broadcast %158 : vector<8x1xf32> to vector<8x8xf32>
      %160 = arith.mulf %155, %159 : vector<8x8xf32>
      %c0_111 = arith.constant 0 : index
      %c8_112 = arith.constant 8 : index
      %161 = vector.load %arg15[%c0_111, %c8_112] : memref<8x32xf32, #tpu.memory_space<vmem>>, vector<8x8xf32>
      tpu.vector_store %arg15[%c0_111, %c8_112], %160 {strides = array<i32>} : memref<8x32xf32, #tpu.memory_space<vmem>>, vector<8x8xf32>,
      %c0_113 = arith.constant 0 : index
      %c16_114 = arith.constant 16 : index
      %162 = vector.load %arg15[%c0_113, %c16_114] : memref<8x32xf32, #tpu.memory_space<vmem>>, vector<8x8xf32>
      %c2_115 = arith.constant 2 : index
      %c0_116 = arith.constant 0 : index
      %c0_117 = arith.constant 0 : index
      %163 = vector.load %arg14[%c2_115, %c0_116, %c0_117] : memref<4x8x1xf32, #tpu.memory_space<vmem>>, vector<1x8x1xf32>
      %164 = vector.shape_cast %163 : vector<1x8x1xf32> to vector<8x1xf32>
      %165 = tpu.reciprocal %164 : vector<8x1xf32> -> vector<8x1xf32>
      %166 = vector.broadcast %165 : vector<8x1xf32> to vector<8x8xf32>
      %167 = arith.mulf %162, %166 : vector<8x8xf32>
      %c0_118 = arith.constant 0 : index
      %c16_119 = arith.constant 16 : index
      %168 = vector.load %arg15[%c0_118, %c16_119] : memref<8x32xf32, #tpu.memory_space<vmem>>, vector<8x8xf32>
      tpu.vector_store %arg15[%c0_118, %c16_119], %167 {strides = array<i32>} : memref<8x32xf32, #tpu.memory_space<vmem>>, vector<8x8xf32>,
      %c0_120 = arith.constant 0 : index
      %c24_121 = arith.constant 24 : index
      %169 = vector.load %arg15[%c0_120, %c24_121] : memref<8x32xf32, #tpu.memory_space<vmem>>, vector<8x8xf32>
      %c3_122 = arith.constant 3 : index
      %c0_123 = arith.constant 0 : index
      %c0_124 = arith.constant 0 : index
      %170 = vector.load %arg14[%c3_122, %c0_123, %c0_124] : memref<4x8x1xf32, #tpu.memory_space<vmem>>, vector<1x8x1xf32>
      %171 = vector.shape_cast %170 : vector<1x8x1xf32> to vector<8x1xf32>
      %172 = tpu.reciprocal %171 : vector<8x1xf32> -> vector<8x1xf32>
      %173 = vector.broadcast %172 : vector<8x1xf32> to vector<8x8xf32>
      %174 = arith.mulf %169, %173 : vector<8x8xf32>
      %c0_125 = arith.constant 0 : index
      %c24_126 = arith.constant 24 : index
      %175 = vector.load %arg15[%c0_125, %c24_126] : memref<8x32xf32, #tpu.memory_space<vmem>>, vector<8x8xf32>
      tpu.vector_store %arg15[%c0_125, %c24_126], %174 {strides = array<i32>} : memref<8x32xf32, #tpu.memory_space<vmem>>, vector<8x8xf32>,
      %c0_127 = arith.constant 0 : index
      %c0_128 = arith.constant 0 : index
      %176 = vector.load %arg15[%c0_127, %c0_128] : memref<8x32xf32, #tpu.memory_space<vmem>>, vector<8x32xf32>
      %c0_129 = arith.constant 0 : index
      %c0_130 = arith.constant 0 : index
      %177 = vector.load %arg9[%c0_129, %c0_130] : memref<32x32xf32, #tpu.memory_space<vmem>>, vector<32x32xf32>
      %cst_131 = arith.constant dense<0.000000e+00> : vector<8x32xf32>
      %178 = tpu.matmul %176, %177, %cst_131 {dimension_numbers = #tpu.dot_dimension_numbers<[1], [0], [0], [1], [0, 0, 1, 1], [], []>} : vector<8x32xf32>, vector<32x32xf32>, vector<8x32xf32> -> vector<8x32xf32>
      %c0_132 = arith.constant 0 : index
      %c0_133 = arith.constant 0 : index
      %179 = vector.load %arg10[%c0_132, %c0_133] : memref<1x32xf32, #tpu.memory_space<vmem>>, vector<1x32xf32>
      %180 = vector.broadcast %179 : vector<1x32xf32> to vector<8x32xf32>
      %181 = arith.addf %178, %180 : vector<8x32xf32>
      %c0_134 = arith.constant 0 : index
      %c0_135 = arith.constant 0 : index
      %c0_136 = arith.constant 0 : index
      %182 = vector.load %arg11[%c0_134, %c0_135, %c0_136] : memref<1x8x32xf32, #tpu.memory_space<vmem>>, vector<1x8x32xf32>
      %183 = vector.shape_cast %182 : vector<1x8x32xf32> to vector<8x32xf32>
      %184 = vector.shape_cast %181 : vector<8x32xf32> to vector<1x8x32xf32>
      tpu.vector_store %arg11[%c0_134, %c0_135, %c0_136], %184 {strides = array<i32>} : memref<1x8x32xf32, #tpu.memory_space<vmem>>, vector<1x8x32xf32>,
    } else {
    }
    return
  }
  func.func @transform_0(%arg0: i32, %arg1: i32) -> (i32, i32, i32) {
    %c0_i32 = arith.constant 0 : i32
    %c0_i32_0 = arith.constant 0 : i32
    %c0_i32_1 = arith.constant 0 : i32
    return %arg0, %c0_i32, %c0_i32_0 : i32, i32, i32
  }
  func.func @transform_1(%arg0: i32, %arg1: i32) -> (i32, i32, i32) {
    %c0_i32 = arith.constant 0 : i32
    %c0_i32_0 = arith.constant 0 : i32
    return %arg0, %arg1, %c0_i32 : i32, i32, i32
  }
  func.func @transform_2(%arg0: i32, %arg1: i32) -> (i32, i32, i32) {
    %c0_i32 = arith.constant 0 : i32
    %c0_i32_0 = arith.constant 0 : i32
    return %arg0, %arg1, %c0_i32 : i32, i32, i32
  }
  func.func @transform_3(%arg0: i32, %arg1: i32) -> (i32, i32, i32, i32) {
    %c0_i32 = arith.constant 0 : i32
    %c0_i32_0 = arith.constant 0 : i32
    %c0_i32_1 = arith.constant 0 : i32
    return %arg0, %c0_i32, %c0_i32_0, %arg1 : i32, i32, i32, i32
  }
  func.func @transform_4(%arg0: i32, %arg1: i32) -> (i32, i32) {
    %c0_i32 = arith.constant 0 : i32
    %c0_i32_0 = arith.constant 0 : i32
    %c0_i32_1 = arith.constant 0 : i32
    return %c0_i32, %c0_i32_0 : i32, i32
  }
  func.func @transform_5(%arg0: i32, %arg1: i32) -> (i32, i32) {
    %c0_i32 = arith.constant 0 : i32
    %c0_i32_0 = arith.constant 0 : i32
    %c0_i32_1 = arith.constant 0 : i32
    return %c0_i32, %c0_i32_0 : i32, i32
  }
  func.func @transform_6(%arg0: i32, %arg1: i32) -> (i32, i32) {
    %c0_i32 = arith.constant 0 : i32
    %c0_i32_0 = arith.constant 0 : i32
    %c0_i32_1 = arith.constant 0 : i32
    return %c0_i32, %c0_i32_0 : i32, i32
  }
  func.func @transform_7(%arg0: i32, %arg1: i32) -> (i32, i32) {
    %c0_i32 = arith.constant 0 : i32
    %c0_i32_0 = arith.constant 0 : i32
    %c0_i32_1 = arith.constant 0 : i32
    return %c0_i32, %c0_i32_0 : i32, i32
  }
  func.func @transform_8(%arg0: i32, %arg1: i32) -> (i32, i32) {
    %c0_i32 = arith.constant 0 : i32
    %c0_i32_0 = arith.constant 0 : i32
    %c0_i32_1 = arith.constant 0 : i32
    return %c0_i32, %c0_i32_0 : i32, i32
  }
  func.func @transform_9(%arg0: i32, %arg1: i32) -> (i32, i32, i32) {
    %c0_i32 = arith.constant 0 : i32
    %c0_i32_0 = arith.constant 0 : i32
    %c0_i32_1 = arith.constant 0 : i32
    return %arg0, %c0_i32, %c0_i32_0 : i32, i32, i32
  }
}

</mosaic_0001>

<bundles_post_ra>
// kernel: tpu_custom_call.1
= control target key start
LH: loop header
LB: loop body
LE: loop exit
PB: predicated region body
PF: predicated region fallthrough
CT: control target
= control target key end

     0   :  { %s3210_s0 = inlined_call_operand.hbm [shape: f32[2,8,32], index: 0, kind: input, shape index: {}]   ;;  %s3211_s1 = inlined_call_operand.hbm [shape: f32[2,8,32], index: 1, kind: input, shape index: {}]   ;;  %s3212_s2 = inlined_call_operand.hbm [shape: f32[2,8,32], index: 2, kind: input, shape index: {}]   ;;  %s3213_s3 = inlined_call_operand.hbm [shape: f32[2,1,8,8], index: 3, kind: input, shape index: {}]   ;;  %s3214_s4 = inlined_call_operand.hbm [shape: f32[32,32], index: 4, kind: input, shape index: {}]   ;;  %s3215_s5 = inlined_call_operand.hbm [shape: f32[32,32], index: 5, kind: input, shape index: {}]   ;;  %s3216_s6 = inlined_call_operand.hbm [shape: f32[32,32], index: 6, kind: input, shape index: {}]   ;;  %s3217_s7 = inlined_call_operand.hbm [shape: f32[32,32], index: 7, kind: input, shape index: {}]   ;;  %s3218_s8 = inlined_call_operand.vmem [shape: f32[1,32], index: 8, kind: input, shape index: {}]   ;;  %s3219_s9 = inlined_call_operand.hbm [shape: f32[2,8,32], index: 9, kind: output, shape index: {}]  }
   0x1   :  { %3243 = sst [smem:[#allocation35_spill]] %s3211_s1 }
   0x2   :  { %3244 = sst [smem:[#allocation36_spill]] %s3214_s4 }
   0x3   :  { %3245 = sst [smem:[#allocation37_spill]] %s3215_s5 }
   0x4   :  { %3246 = sst [smem:[#allocation38_spill]] %s3218_s8 }
   0x5   :  { %3247 = sst [smem:[#allocation39_spill]] %s3219_s9 }
   0x6   :  { %14 = vsyncpa [#allocation7], 0 }
   0x7   :  { %16 = vsyncpa [#allocation7 + $0x1], 0 }
   0x8   :  { %17 = vsyncpa [#allocation10], 0 }
   0x9   :  { %19 = vsyncpa [#allocation10 + $0x1], 0 }
   0xa   :  { %20 = vsyncpa [#allocation13], 0 }
   0xb   :  { %22 = vsyncpa [#allocation13 + $0x1], 0 }
   0xc   :  { %23 = vsyncpa [#allocation16], 0 }
   0xd   :  { %24 = vsyncpa [#allocation19], 0 }
   0xe   :  { %25 = vsyncpa [#allocation8], 0 }
   0xf   :  { %27 = vsyncpa [#allocation8 + $0x1], 0  ;;  %s2645_s30 = smov 0   ;;  %s2647_s10 = smov 0  }
  0x10   :  { %s2649_s11 = smov 0   ;;  %s2651_s12 = smov 0  }
  0x11   :  { %s2653_s13 = smov 0   ;;  %s2655_s14 = smov 0  }
  0x12 LB: > { %3248 = sst [smem:[#allocation28_spill]] %s2551_s30  ;;  %s2676_s15 = sadd.s32 4294967295, %s2571_s14   ;;  %s2571_s14 = sphi %s2655_s14, %s33_s14   ;;  %s2567_s13 = sphi %s2653_s13, %s3295_s13   ;;  %s2563_s12 = sphi %s2651_s12, %s3294_s12   ;;  %s2559_s11 = sphi %s2649_s11, %s3298_s11   ;;  %s2555_s10 = sphi %s2647_s10, %s3297_s10   ;;  %s2551_s30 = sphi %s2645_s30, %s3296_s30  }
  0x13   : > { %3249 = sst [smem:[#allocation29_spill]] %s2563_s12  ;;  %s1890_s16 = sadd.s32 4294967294, %s2571_s14  }
  0x14   : > { %3250 = sst [smem:[#allocation30_spill]] %s2567_s13  ;;  %p65_p0 = scmp.ne.s32.totalorder %s2555_s10, %s2551_s30 }
  0x15   : > { %p3220_p1 = scmp.eq.s32.totalorder %s2676_s15, 0  ;;  %p284_p3 = scmp.eq.s32.totalorder %s1890_s16, 1 }
  0x16   : > { %p1891_p5 = scmp.ge.s32.totalorder %s2571_s14, 1  ;;  %p291_p7 = scmp.lt.s32.totalorder %s2571_s14, 3 }
  0x17   : > { %p2685_p4 = por %p3220_p1, %p65_p0  ;;  %p2690_p6 = por %p284_p3, %p65_p0 }
  0x18   : > { %p2695_p8 = pnand %p1891_p5, %p291_p7  ;;  %s2573_s20 = smov [#allocation14]  }
  0x19   : > { %s3251_s17 = scalar_select %p2685_p4, 1, 0 }
  0x1a   : > { %s3252_s18 = scalar_select %p2690_p6, 1, 0 }
  0x1b   : > { %s3254_s19 = scalar_select %p2695_p8, 1, 0 }
  0x1c   : > { %3253 = sst [smem:[#allocation31_spill]] %s3252_s18  ;;  %s303_s21 = sshll.u32 %s2573_s20, 4  ;;  %s2699_s21 = int_to_ptr.vmem [resolvable:$true] %s303_s21 }
  0x1d   : > { %p2106_p9 = pneg %p2695_p8  ;;  %s2574_s23 = smov [#allocation15]  }
  0x1e   : > { %s316_s24 = sshll.u32 %s2574_s23, 4  ;;  %s3256_s4 = sld [smem:[#allocation36_spill]]  ;;  %s2710_s24 = int_to_ptr.vmem [resolvable:$true] %s316_s24 }
  0x1f   : > { %p2706_p11 = pnand %p2106_p9, %p3220_p1 }
  0x21   : > { %s3255_s22 = scalar_select %p2706_p11, 1, 0 }
  0x22   : > { %p2720_p13 = pneg %p2706_p11 }
  0x24   : > { %s2237_s27 = scalar_lea.hbm %s3256_s4, 512 }
  0x25   : > { %p2238_p12 = scmp.ne.s32.totalorder %s3256_s4, %s2237_s27  ;;  %p2244_p5 = scmp.lt.u32.totalorder %s2237_s27, %s3256_s4 }
  0x26   : > { %s3257_s16 = scalar_select %p2720_p13, 1, 0 }
  0x27   : > { %p2240_p0 = pnand %p2720_p13, %p2238_p12 }
  0x29   : > { %p2241_p3 = pneg %p2240_p0 }
  0x2b   : > { %p2246_p7 = pnand %p2244_p5, %p2241_p3 }
  0x2d   : > { %2249 = shalt.err (!%p2246_p7)
}
  0x2e   : > { %s2250_s25 = scalar_lea.vmem %s2699_s21, 512  ;;  %p2258_p2 = scmp.lt.s32.totalorder %s2699_s21, %s2699_s21 }
  0x2f   : > { %p2251_p9 = scmp.ne.s32.totalorder %s2699_s21, %s2250_s25  ;;  %p2259_p6 = scmp.lt.s32.totalorder %s2250_s25, %s2250_s25 }
  0x31   : > { %p2253_p10 = pnand %p2251_p9, %p2720_p13  ;;  %p2260_p12 = por %p2259_p6, %p2258_p2 }
  0x33   : > { %p2254_p1 = pneg %p2253_p10 }
  0x35   : > { %p2261_p0 = pnand %p2260_p12, %p2254_p1 }
  0x37   : > { %2264 = shalt.err (!%p2261_p0)
}
  0x38   : > { %s3224_s26 = smov 128   ;;  %s3226_s27 = smov 8  }
  0x39   : > { %2109 = dma.hbm_to_vmem [thread:$0]  (!%p2706_p11), %s3256_s4, 512, %s2699_s21, [#allocation13], %s3224_s26, %s3224_s26, %s3226_s27  }
  0x3a   : > { %s3258_s5 = sld [smem:[#allocation37_spill]] }
  0x40   : > { %s2265_s25 = scalar_lea.hbm %s3258_s5, 512 }
  0x41   : > { %p2266_p1 = scmp.ne.s32.totalorder %s3258_s5, %s2265_s25  ;;  %p2272_p10 = scmp.lt.u32.totalorder %s2265_s25, %s3258_s5 }
  0x43   : > { %p2268_p2 = pnand %p2266_p1, %p2720_p13 }
  0x45   : > { %p2269_p6 = pneg %p2268_p2 }
  0x47   : > { %p2274_p3 = pnand %p2272_p10, %p2269_p6 }
  0x49   : > { %2277 = shalt.err (!%p2274_p3)
}
  0x4a   : > { %s2278_s21 = scalar_lea.vmem %s2710_s24, 512  ;;  %p2286_p12 = scmp.lt.s32.totalorder %s2710_s24, %s2710_s24 }
  0x4b   : > { %p2279_p5 = scmp.ne.s32.totalorder %s2710_s24, %s2278_s21  ;;  %p2287_p0 = scmp.lt.s32.totalorder %s2278_s21, %s2278_s21 }
  0x4d   : > { %p2281_p7 = pnand %p2279_p5, %p2720_p13  ;;  %p2288_p1 = por %p2287_p0, %p2286_p12 }
  0x4f   : > { %p2282_p9 = pneg %p2281_p7 }
  0x51   : > { %p2289_p2 = pnand %p2288_p1, %p2282_p9 }
  0x53   : > { %2292 = shalt.err (!%p2289_p2)
}
  0x54   : > { %2112 = dma.hbm_to_vmem [thread:$0]  (!%p2706_p11), %s3258_s5, 512, %s2710_s24, [#allocation16], %s3224_s26, %s3224_s26, %s3226_s27  }
  0x55   : > { %s45_s30 = sadd.s32 1, %s2567_s13  ;;  %s52_s18 = sadd.s32 1, %s2559_s11 }
  0x56   : > { %p47_p6 = scmp.ge.s32.totalorder %s45_s30, 2  ;;  %p59_p10 = scmp.ne.s32.totalorder %s2559_s11, %s2555_s10 }
  0x57   : > { %p60_p3 = scmp.eq.s32.totalorder %s2571_s14, 0  ;;  %p2140_p5 = scmp.lt.s32.totalorder %s2571_s14, 2 }
  0x58   : > { %s3300_s30 = smov (%p47_p6, %s45_s30), 0  ;;  %p3260_p9 = scmp.eq.s32.totalorder %s2676_s15, 1 }
  0x59   : > { %3259 = sst [smem:[#allocation32_spill]] %s3300_s30  ;;  %p61_p7 = por %p60_p3, %p59_p10 }
  0x5a   : > { %p2780_p12 = por %p3260_p9, %p59_p10  ;;  %s49_s29 = ssub.s32 %s2567_s13, %s3300_s30 }
  0x5b   : > { %s3228_s24 = sand.u32 1, %s2559_s11   ;;  %p50_p0 = scmp.eq.s32.totalorder %s49_s29, 0 }
  0x5c   : > { %s3261_s28 = scalar_select %p2780_p12, 1, 0 }
  0x5d   : > { %s2789_s20 = sshll.u32 %s3228_s24, 3  ;;  %s2792_s23 = sshll.u32 %s2567_s13, 7 }
  0x5e   : > { %3262 = sst [smem:[#allocation33_spill]] %s3261_s28  ;;  %p2794_p1 = pnand %p2140_p5, %p61_p7 }
  0x5f   : > { %s2799_s21 = scalar_select %p50_p0, %s2559_s11, %s52_s18  }
  0x60   : > { %s3263_s25 = scalar_select %p2794_p1, 1, 0 }
  0x61   : > { %3264 = sst [smem:[#allocation34_spill]] %s2799_s21  ;;  %s3233_s8 = sand.u32 1, %s2571_s14  }
  0x62   : > { %s3265_s1 = sld [smem:[#allocation35_spill]]  ;;  %s381_s29 = scalar_lea.vmem [#allocation9], %s2789_s20 }
  0x63   : > { %s389_s24 = sshll.u32 %s381_s29, 4  ;;  %s2813_s4 = scalar_lea.sflag [#allocation10], %s3233_s8  ;;  %s2809_s24 = int_to_ptr.vmem [resolvable:$true] %s389_s24 }
  0x64   : > { %p2819_p6 = pneg %p2794_p1 }
  0x68   : > { %s2806_s27 = scalar_lea.hbm %s3265_s1, %s2792_s23  ;;  %s2298_s29 = scalar_lea.hbm %s3265_s1, 256 }
  0x69   : > { %s2293_s5 = scalar_lea.hbm %s2806_s27, 128  ;;  %p2299_p5 = scmp.lt.u32.totalorder %s2806_s27, %s3265_s1 }
  0x6a   : > { %p2294_p2 = scmp.ne.s32.totalorder %s2806_s27, %s2293_s5  ;;  %p2300_p7 = scmp.lt.u32.totalorder %s2298_s29, %s2293_s5 }
  0x6b   : > { %p2302_p0 = scmp.lt.u32.totalorder %s2293_s5, %s2806_s27 }
  0x6c   : > { %p2296_p10 = pnand %p2819_p6, %p2294_p2  ;;  %p2301_p9 = por %p2300_p7, %p2299_p5 }
  0x6e   : > { %p2297_p3 = pneg %p2296_p10  ;;  %p2303_p12 = por %p2302_p0, %p2301_p9 }
  0x70   : > { %p2304_p4 = pnand %p2303_p12, %p2297_p3 }
  0x72   : > { %2307 = shalt.err (!%p2304_p4)
}
  0x73   : > { %s2308_s8 = scalar_lea.vmem %s2809_s24, 128  ;;  %s2577_s26 = smov [#allocation9]  }
  0x74   : > { %p2309_p2 = scmp.ne.s32.totalorder %s2809_s24, %s2308_s8  ;;  %s2313_s9 = sshll.u32 %s2577_s26, 4  ;;  %s2314_s9 = int_to_ptr.vmem [resolvable:$false] %s2313_s9 }
  0x75   : > { %s2315_s13 = scalar_lea.vmem %s2314_s9, 256  ;;  %p2316_p11 = scmp.lt.s32.totalorder %s2809_s24, %s2314_s9 }
  0x76   : > { %p2311_p10 = pnand %p2309_p2, %p2819_p6  ;;  %p2317_p13 = scmp.lt.s32.totalorder %s2315_s13, %s2308_s8 }
  0x78   : > { %p2312_p8 = pneg %p2311_p10  ;;  %p2318_p5 = por %p2317_p13, %p2316_p11 }
  0x7a   : > { %p2319_p7 = pnand %p2318_p5, %p2312_p8 }
  0x7c   : > { %2322 = shalt.err (!%p2319_p7)
}
  0x7d   : > { %2125 = dma.hbm_to_vmem [thread:$0]  (!%p2794_p1), %s2806_s27, 128, %s2809_s24, %s2813_s4  }
  0x7e   : > { %s2578_s5 = smov [#allocation17]   ;;  %s2579_s29 = smov [#allocation18]  }
  0x7f   : > { %s329_s30 = sshll.u32 %s2578_s5, 4  ;;  %s342_s1 = sshll.u32 %s2579_s29, 4  ;;  %s330_s30 = int_to_ptr.vmem [resolvable:$true] %s329_s30  ;;  %s2843_s1 = int_to_ptr.vmem [resolvable:$true] %s342_s1 }
  0x80   : > { %s2323_s8 = scalar_lea.hbm %s3216_s6, 512  ;;  %p3267_p8 = scmp.ne.s32.totalorder %s3257_s16, 0 }
  0x81   : > { %p2324_p4 = scmp.ne.s32.totalorder %s3216_s6, %s2323_s8  ;;  %p2330_p12 = scmp.lt.u32.totalorder %s2323_s8, %s3216_s6 }
  0x83   : > { %p2326_p11 = pnand %p2324_p4, %p3267_p8 }
  0x85   : > { %p2327_p13 = pneg %p2326_p11 }
  0x87   : > { %p2332_p3 = pnand %p2330_p12, %p2327_p13 }
  0x89   : > { %2335 = shalt.err (!%p2332_p3)
}
  0x8a   : > { %s2336_s24 = scalar_lea.vmem %s330_s30, 512  ;;  %p2344_p10 = scmp.lt.s32.totalorder %s330_s30, %s330_s30 }
  0x8b   : > { %p2337_p9 = scmp.ne.s32.totalorder %s330_s30, %s2336_s24  ;;  %p2345_p5 = scmp.lt.s32.totalorder %s2336_s24, %s2336_s24 }
  0x8d   : > { %p2339_p0 = pnand %p2337_p9, %p3267_p8  ;;  %p2346_p7 = por %p2345_p5, %p2344_p10 }
  0x8f   : > { %p2340_p2 = pneg %p2339_p0 }
  0x91   : > { %p2347_p1 = pnand %p2346_p7, %p2340_p2 }
  0x93   : > { %2350 = shalt.err (!%p2347_p1)
}
  0x94   : > { %p3268_p4 = scmp.ne.s32.totalorder %s3255_s22, 0  ;;  %s3269_s21 = smov 8  }
  0x95   : > { %s3270_s5 = smov 128   ;;  %s2351_s8 = scalar_lea.hbm %s3217_s7, 512 }
  0x96   : > { %2115 = dma.hbm_to_vmem [thread:$0]  (!%p3268_p4), %s3216_s6, 512, %s330_s30, [#allocation16], %s3270_s5, %s3270_s5, %s3269_s21  }
  0x97   : > { %p2352_p11 = scmp.ne.s32.totalorder %s3217_s7, %s2351_s8  ;;  %p2358_p12 = scmp.lt.u32.totalorder %s2351_s8, %s3217_s7 }
  0x99   : > { %p2354_p1 = pnand %p2352_p11, %p3267_p8 }
  0x9b   : > { %p2355_p13 = pneg %p2354_p1 }
  0x9d   : > { %p2360_p3 = pnand %p2358_p12, %p2355_p13 }
  0x9f   : > { %2363 = shalt.err (!%p2360_p3)
}
  0xa0   : > { %s2364_s30 = scalar_lea.vmem %s2843_s1, 512  ;;  %p2372_p10 = scmp.lt.s32.totalorder %s2843_s1, %s2843_s1 }
  0xa1   : > { %p2365_p9 = scmp.ne.s32.totalorder %s2843_s1, %s2364_s30  ;;  %p2373_p5 = scmp.lt.s32.totalorder %s2364_s30, %s2364_s30 }
  0xa3   : > { %p2367_p0 = pnand %p2365_p9, %p3267_p8  ;;  %p2374_p7 = por %p2373_p5, %p2372_p10 }
  0xa5   : > { %p2368_p2 = pneg %p2367_p0 }
  0xa7   : > { %p2375_p11 = pnand %p2374_p7, %p2368_p2 }
  0xa9   : > { %2378 = shalt.err (!%p2375_p11)
}
  0xaa   : > { %2118 = dma.hbm_to_vmem [thread:$0]  (!%p3268_p4), %s3217_s7, 512, %s2843_s1, [#allocation19], %s3270_s5, %s3270_s5, %s3269_s21  }
  0xab   : > { %s2896_s26 = scalar_lea.hbm %s3210_s0, %s2792_s23  ;;  %s363_s22 = scalar_lea.vmem [#allocation6], %s2789_s20 }
  0xac   : > { %s370_s9 = sshll.u32 %s363_s22, 4  ;;  %s3271_s8 = sand.u32 1, %s2559_s11   ;;  %s371_s9 = int_to_ptr.vmem [resolvable:$true] %s370_s9 }
  0xad   : > { %s360_s13 = scalar_lea.sflag [#allocation7], %s3271_s8  ;;  %s2379_s27 = scalar_lea.hbm %s2896_s26, 128 }
  0xae   : > { %p2380_p8 = scmp.ne.s32.totalorder %s2896_s26, %s2379_s27  ;;  %s2384_s5 = scalar_lea.hbm %s3210_s0, 256 }
  0xaf   : > { %p2385_p4 = scmp.lt.u32.totalorder %s2896_s26, %s3210_s0  ;;  %p2386_p12 = scmp.lt.u32.totalorder %s2384_s5, %s2379_s27 }
  0xb0   : > { %p2382_p1 = pnand %p2380_p8, %p2819_p6  ;;  %p2388_p9 = scmp.lt.u32.totalorder %s2379_s27, %s2896_s26 }
  0xb1   : > { %p2387_p3 = por %p2386_p12, %p2385_p4 }
  0xb2   : > { %p2383_p13 = pneg %p2382_p1 }
  0xb3   : > { %p2389_p0 = por %p2388_p9, %p2387_p3 }
  0xb5   : > { %p2390_p2 = pnand %p2389_p0, %p2383_p13 }
  0xb7   : > { %2393 = shalt.err (!%p2390_p2)
}
  0xb8   : > { %s2394_s12 = scalar_lea.vmem %s371_s9, 128  ;;  %s2580_s28 = smov [#allocation6]  }
  0xb9   : > { %p2395_p10 = scmp.ne.s32.totalorder %s371_s9, %s2394_s12  ;;  %s2399_s16 = sshll.u32 %s2580_s28, 4  ;;  %s2400_s16 = int_to_ptr.vmem [resolvable:$false] %s2399_s16 }
  0xba   : > { %s2401_s29 = scalar_lea.vmem %s2400_s16, 256  ;;  %p2402_p11 = scmp.lt.s32.totalorder %s371_s9, %s2400_s16 }
  0xbb   : > { %p2397_p5 = pnand %p2395_p10, %p2819_p6  ;;  %p2403_p8 = scmp.lt.s32.totalorder %s2401_s29, %s2394_s12 }
  0xbd   : > { %p2398_p7 = pneg %p2397_p5  ;;  %p2404_p1 = por %p2403_p8, %p2402_p11 }
  0xbf   : > { %p2405_p4 = pnand %p2404_p1, %p2398_p7 }
  0xc1   : > { %2408 = shalt.err (!%p2405_p4)
}
  0xc2   : > { %p3272_p12 = scmp.ne.s32.totalorder %s3263_s25, 0  ;;  %s2922_s27 = scalar_lea.hbm %s3212_s2, %s2792_s23 }
  0xc3   : > { %s400_s1 = scalar_lea.vmem [#allocation11], %s2789_s20  ;;  %s2409_s5 = scalar_lea.hbm %s2922_s27, 128 }
  0xc4   : > { %2122 = dma.hbm_to_vmem [thread:$0]  (!%p3272_p12), %s2896_s26, 128, %s371_s9, %s360_s13  }
  0xc5   : > { %s408_s21 = sshll.u32 %s400_s1, 4  ;;  %p2410_p13 = scmp.ne.s32.totalorder %s2922_s27, %s2409_s5  ;;  %s409_s21 = int_to_ptr.vmem [resolvable:$true] %s408_s21 }
  0xc6   : > { %s2414_s26 = scalar_lea.hbm %s3212_s2, 256  ;;  %p2415_p0 = scmp.lt.u32.totalorder %s2922_s27, %s3212_s2 }
  0xc7   : > { %p2412_p3 = pnand %p2410_p13, %p2819_p6  ;;  %p2416_p2 = scmp.lt.u32.totalorder %s2414_s26, %s2409_s5 }
  0xc8   : > { %p2418_p5 = scmp.lt.u32.totalorder %s2409_s5, %s2922_s27 }
  0xc9   : > { %p2413_p9 = pneg %p2412_p3  ;;  %p2417_p10 = por %p2416_p2, %p2415_p0 }
  0xcb   : > { %p2419_p7 = por %p2418_p5, %p2417_p10 }
  0xcd   : > { %p2420_p11 = pnand %p2419_p7, %p2413_p9 }
  0xcf   : > { %2423 = shalt.err (!%p2420_p11)
}
  0xd0   : > { %s2424_s12 = scalar_lea.vmem %s409_s21, 128  ;;  %s2581_s28 = smov [#allocation11]  }
  0xd1   : > { %p2425_p8 = scmp.ne.s32.totalorder %s409_s21, %s2424_s12  ;;  %s2429_s16 = sshll.u32 %s2581_s28, 4  ;;  %s2430_s16 = int_to_ptr.vmem [resolvable:$false] %s2429_s16 }
  0xd2   : > { %s2431_s29 = scalar_lea.vmem %s2430_s16, 256  ;;  %p2432_p13 = scmp.lt.s32.totalorder %s409_s21, %s2430_s16 }
  0xd3   : > { %p2427_p1 = pnand %p2425_p8, %p2819_p6  ;;  %p2433_p3 = scmp.lt.s32.totalorder %s2431_s29, %s2424_s12 }
  0xd5   : > { %p2428_p4 = pneg %p2427_p1  ;;  %p2434_p12 = por %p2433_p3, %p2432_p13 }
  0xd7   : > { %p2435_p0 = pnand %p2434_p12, %p2428_p4 }
  0xd9   : > { %2438 = shalt.err (!%p2435_p0)
}
  0xda   : > { %p3273_p2 = scmp.ne.s32.totalorder %s3263_s25, 0  ;;  %s2947_s1 = scalar_lea.hbm %s3213_s3, %s2792_s23 }
  0xdb   : > { %s419_s5 = scalar_lea.vmem [#allocation12], %s2789_s20  ;;  %s3274_s30 = sand.u32 1, %s2571_s14  }
  0xdc   : > { %2128 = dma.hbm_to_vmem [thread:$0]  (!%p3273_p2), %s2922_s27, 128, %s409_s21, %s2813_s4  }
  0xdd   : > { %s427_s24 = sshll.u32 %s419_s5, 4  ;;  %s416_s26 = scalar_lea.sflag [#allocation13], %s3274_s30  ;;  %s428_s24 = int_to_ptr.vmem [resolvable:$true] %s427_s24 }
  0xde   : > { %s2439_s9 = scalar_lea.hbm %s2947_s1, 128  ;;  %s2444_s21 = scalar_lea.hbm %s3213_s3, 256 }
  0xdf   : > { %p2440_p12 = scmp.ne.s32.totalorder %s2947_s1, %s2439_s9  ;;  %p2445_p5 = scmp.lt.u32.totalorder %s2947_s1, %s3213_s3 }
  0xe0   : > { %p2446_p7 = scmp.lt.u32.totalorder %s2444_s21, %s2439_s9  ;;  %p2448_p8 = scmp.lt.u32.totalorder %s2439_s9, %s2947_s1 }
  0xe1   : > { %p2442_p9 = pnand %p2440_p12, %p2819_p6 }
  0xe2   : > { %p2447_p11 = por %p2446_p7, %p2445_p5 }
  0xe3   : > { %p2443_p10 = pneg %p2442_p9 }
  0xe4   : > { %p2449_p1 = por %p2448_p8, %p2447_p11 }
  0xe6   : > { %p2450_p4 = pnand %p2449_p1, %p2443_p10 }
  0xe8   : > { %2453 = shalt.err (!%p2450_p4)
}
  0xe9   : > { %s2454_s20 = scalar_lea.vmem %s428_s24, 128  ;;  %s2582_s12 = smov [#allocation12]  }
  0xea   : > { %p2455_p13 = scmp.ne.s32.totalorder %s428_s24, %s2454_s20  ;;  %s2459_s28 = sshll.u32 %s2582_s12, 4  ;;  %s2460_s28 = int_to_ptr.vmem [resolvable:$false] %s2459_s28 }
  0xeb   : > { %s2461_s16 = scalar_lea.vmem %s2460_s28, 256  ;;  %p2462_p12 = scmp.lt.s32.totalorder %s428_s24, %s2460_s28 }
  0xec   : > { %p2457_p3 = pnand %p2455_p13, %p2819_p6  ;;  %p2463_p9 = scmp.lt.s32.totalorder %s2461_s16, %s2454_s20 }
  0xee   : > { %p2458_p0 = pneg %p2457_p3  ;;  %p2464_p2 = por %p2463_p9, %p2462_p12 }
  0xf0   : > { %p2465_p5 = pnand %p2464_p2, %p2458_p0 }
  0xf2   : > { %2468 = shalt.err (!%p2465_p5)
}
  0xf3   : > { %p3275_p7 = scmp.ne.s32.totalorder %s3263_s25, 0  ;;  %p3276_p10 = scmp.ne.s32.totalorder %s3254_s19, 0 }
  0xf4   : > { %s2972_s18 = sand.u32 (!%p3276_p10), 1, %s2555_s10   ;;  %p3277_p6 = scmp.ne.s32.totalorder (!%p3276_p10), %s3251_s17, 0 }
  0xf5   : > { %2131 = dma.hbm_to_vmem [thread:$0]  (!%p3275_p7), %s2947_s1, 128, %s428_s24, %s416_s26  }
  0xf6   : > { %436 = sbr.rel (%p3276_p10) target bundleno = 2138 (0x85a), region = 56  ;;  %s2975_s29 = sshll.u32 (!%p3276_p10), %s2972_s18, 3 }
  0xf7   : > { %s439_s22 = scalar_lea.sflag (!%p3276_p10), [#allocation7], %s2972_s18  ;;  %s442_s8 = scalar_lea.vmem (!%p3276_p10), [#allocation6], %s2975_s29 }
  0xfd   : > { %2522 = dma.done.wait (%p3277_p6), %s439_s22, 128  }
  0xfe   : > { %2524 = vsyncadd (%p3277_p6), %s439_s22, 4294967168  ;;  %s447_s19 = sand.u32 1, %s2676_s15   ;;  %s451_s1 = scalar_lea.vmem [#allocation9], %s2975_s29 }
  0xff   : > { %s448_s25 = scalar_lea.sflag [#allocation10], %s447_s19 }
 0x100   : > { %2526 = dma.done.wait (%p3277_p6), %s448_s25, 256  }
 0x101   : > { %2528 = vsyncadd (%p3277_p6), %s448_s25, 4294967040  ;;  %s460_s5 = scalar_lea.vmem [#allocation11], %s2975_s29  ;;  %s466_s24 = scalar_lea.sflag [#allocation13], %s447_s19 }
 0x102   : > { %s469_s30 = scalar_lea.vmem [#allocation12], %s2975_s29 }
 0x103   : > { %2530 = dma.done.wait (%p3277_p6), %s466_s24, 128  }
 0x104   : > { %2532 = vsyncadd (%p3277_p6), %s466_s24, 4294967168  ;;  %p3278_p2 = scmp.eq.s32.totalorder %s2676_s15, 0 }
 0x106   : > { %2534 = dma.done.wait (%p3278_p2), [#allocation13], 512   ;;  %p3279_p11 = pmov %p3278_p2 }
 0x107   : > { %p3280_p8 = pmov %p3278_p2 }
 0x108   : > { %2536 = vsyncadd (%p3279_p11), [#allocation13], 4294966784 }
 0x109   : > { %2538 = dma.done.wait (%p3280_p8), [#allocation16], 1024   ;;  %p3281_p1 = pmov %p3278_p2 }
 0x10b   : > { %2540 = vsyncadd (%p3281_p1), [#allocation16], 4294966272  ;;  %p3282_p4 = pmov %p3281_p1 }
 0x10c   : > { %p3283_p13 = pmov %p3281_p1 }
 0x10d   : > { %2542 = dma.done.wait (%p3282_p4), [#allocation19], 512  }
 0x10e   : > { %2544 = vsyncadd (%p3283_p13), [#allocation19], 4294966784  ;;  %vm544_vm0 = vcmask 261120   ;;  %v2583_v0 = vmov 0.0|0.0   ;;  %v2584_v1 = vmov 0.0   ;;  %vm2585_vm1 = vmmov 0  }
 0x10f   : > { %2056 = vmatprep.subr.bf16.mxu0 %v2583_v0  ;;  %2062 = vmatprep.subr.bf16.mxu1 %v2583_v0  ;;  %628 = vst.msk [vmem:[#allocation5] sm:$0xff] %vm544_vm0, %v2584_v1  ;;  %v540_v2 = vld [vmem:[#allocation14] sm:$0xff]  ;;  %v541_v3 = vld [vmem:[#allocation14 + $0x8] sm:$0xff]  ;;  %v542_v7 = vld [vmem:[#allocation14 + $0x10] sm:$0xff]  ;;  %vm788_vm2 = vcmask 64512   ;;  %s2586_s15 = smov 120  }
 0x110   : > { %1980 = vmatprep.mubr.msk.f32.mxu0 %vm2585_vm1, %v2584_v1  ;;  %1991 = vmatprep.mubr.msk.f32.mxu1 %vm2585_vm1, %v2584_v1  ;;  %v630_v4 = vld [vmem:[#allocation15] sm:$0xff]  ;;  %v2057_v5 = vpack.c.bf16 %v541_v3, %v540_v2  ;;  %v631_v6 = vld [vmem:[#allocation15 + $0x8] sm:$0xff]  ;;  %v543_v8 = vld [vmem:[#allocation14 + $0x18] sm:$0xff]  ;;  %s2587_s17 = smov 112   ;;  %s2588_s26 = smov 104   ;;  %vm619_vm3 = vcmask 7168  }
 0x111   : > { %v2063_v9 = vpack.c.bf16 %v631_v6, %v630_v4  ;;  %v632_v10 = vld [vmem:[#allocation15 + $0x10] sm:$0xff]  ;;  %v633_v11 = vld [vmem:[#allocation15 + $0x18] sm:$0xff]  ;;  %v2060_v12 = vpack.c.bf16 %v543_v8, %v542_v7  ;;  %v539_v14 = vld [vmem:[%s442_s8] sm:$0xff]  ;;  %v2589_v41 = vmov -inf   ;;  %624 = vst.msk [vmem:[#allocation4] sm:$0xff] %vm619_vm3, %v2584_v1  ;;  %v2590_v42 = vmov 0  }
 0x112   : > { %2058 = vmatpush3.bf16.msra.mxu0 %v2057_v5  ;;  %v2066_v13 = vpack.c.bf16 %v633_v11, %v632_v10  ;;  %v629_v15 = vld [vmem:[%s451_s1] sm:$0xff]  ;;  %v709_v16 = vld [vmem:[#allocation17] sm:$0xff]  ;;  %v710_v17 = vld [vmem:[#allocation17 + $0x8] sm:$0xff]  ;;  %620 = vst.msk [vmem:[#allocation3] sm:$0xff] %vm619_vm3, %v2589_v41  ;;  %2211 = vset.pattern.permute.xlu0 %v2590_v42  ;;  %s2591_s9 = smov 8   ;;  %s2592_s4 = smov 16  }
 0x113   : > { %2059 = vmatprep.subr.bf16.mxu0 %v2583_v0  ;;  %2064 = vmatpush3.bf16.msra.mxu1 %v2063_v9  ;;  %v2069_v18 = vpack.c.bf16 %v710_v17, %v709_v16  ;;  %v711_v19 = vld [vmem:[#allocation17 + $0x10] sm:$0xff]  ;;  %v712_v20 = vld [vmem:[#allocation17 + $0x18] sm:$0xff]  ;;  %v708_v22 = vld [vmem:[%s460_s5] sm:$0xff]  ;;  %621 = vst.msk [vmem:[#allocation3 + $0x8] sm:$0xff] %vm619_vm3, %v2589_v41  ;;  %s2593_s27 = smov 24   ;;  %vm1166_vm4 = vcmask 130112  }
 0x114   : > { %2065 = vmatprep.subr.bf16.mxu1 %v2583_v0  ;;  %v2072_v21 = vpack.c.bf16 %v712_v20, %v711_v19  ;;  %v786_v36 = vld [vmem:[%s469_s30] sm:$0xff]  ;;  %622 = vst.msk [vmem:[#allocation3 + $0x10] sm:$0xff] %vm619_vm3, %v2589_v41  ;;  %623 = vst.msk [vmem:[#allocation3 + $0x18] sm:$0xff] %vm619_vm3, %v2589_v41  ;;  %2212 = vset.pattern.permute.xlu1 %v2590_v42  ;;  %vm1362_vm5 = vcmask 195712   ;;  %vm1558_vm6 = vcmask 261312   ;;  %s3284_s21 = sld [smem:[#allocation29_spill]] }
 0x115   : > { %625 = vst.msk [vmem:[#allocation4 + $0x8] sm:$0xff] %vm619_vm3, %v2584_v1  ;;  %626 = vst.msk [vmem:[#allocation4 + $0x10] sm:$0xff] %vm619_vm3, %v2584_v1  ;;  %s3285_s23 = sld [smem:[#allocation33_spill]]  ;;  %s534_s16 = scalar_lea.vmem [#allocation20], %s2975_s29 }
 0x116   : > { %2061 = vmatpush3.bf16.msra.mxu0 %v2060_v12  ;;  %627 = vst.msk [vmem:[#allocation4 + $0x18] sm:$0xff] %vm619_vm3, %v2584_v1  ;;  %s3286_s12 = sld [smem:[#allocation38_spill]]  ;;  %s1704_s22 = sshll.u32 %s534_s16, 4  ;;  %s3162_s22 = int_to_ptr.vmem [resolvable:$true] %s1704_s22 }
 0x117   : > { %2067 = vmatpush3.bf16.msra.mxu1 %v2066_v13  ;;  %2068 = vmatprep.subr.bf16.mxu0 %v2583_v0  ;;  %s3287_s25 = sld [smem:[#allocation39_spill]]  ;;  %s1691_s5 = scalar_lea.sflag [#allocation8], %s2972_s18 }
 0x118   : > { %2005 = vmatprep.subr.mxu1 %v2584_v1  ;;  %v881_v41 = vld [vmem:[#allocation4] sm:$0xff]  ;;  %s2469_s24 = scalar_lea.vmem %s3162_s22, 128  ;;  %s2594_s29 = smov [#allocation20]  }
 0x119   : > { %1981 = vmatmul.mubr.msk.f32.vlgmr.msra.gmra.mrb[0].mxu0 %vm544_vm0, %v539_v14  ;;  %v3077_v47 = vld [vmem:[#allocation3] sm:$0xff]  ;;  %p2470_p3 = scmp.ne.s32.totalorder %s3162_s22, %s2469_s24  ;;  %s2473_s30 = sshll.u32 %s2594_s29, 4  ;;  %s2474_s30 = int_to_ptr.vmem [resolvable:$false] %s2473_s30 }
 0x11a   : > { %1992 = vmatmul.mubr.msk.f32.vlgmr.msra.gmra.mrb[0].mxu1 %vm544_vm0, %v629_v15  ;;  %2002 = vmatprep.mubr.msk.f32.mxu0 %vm2585_vm1, %v2584_v1  ;;  %v1053_v7 = vld [vmem:[#allocation3 + $0x8] sm:$0xff]  ;;  %s1933_s28 = sshll.u32 %s3284_s21, 7  ;;  %p2476_p5 = scmp.lt.s32.totalorder %s3162_s22, %s2474_s30 }
 0x11b   : > { %2007 = vmatprep.mubr.msk.f32.mxu1 %vm2585_vm1, %v2584_v1  ;;  %2070 = vmatpush3.bf16.msra.mxu0 %v2069_v18  ;;  %v3096_v57 = vld [vmem:[#allocation3 + $0x10] sm:$0xff]  ;;  %v1446_v10 = vld [vmem:[#allocation3 + $0x18] sm:$0xff]  ;;  %p3288_p0 = scmp.ne.s32.totalorder %s3285_s23, 0 }
 0x11c   : > { %2071 = vmatprep.subr.bf16.mxu0 %v2583_v0 }
 0x11d   : > { %s3160_s1 = scalar_lea.hbm %s3287_s25, %s1933_s28  ;;  %p2471_p12 = pnand %p2470_p3, %p3288_p0 }
 0x11f   : > { %2073 = vmatpush3.bf16.msra.mxu0 %v2072_v21  ;;  %p2472_p9 = pneg %p2471_p12 }
 0x120   : > { %2025 = vmatprep.subr.mxu0 %v2584_v1 }
 0x122   : > { %2003 = vmatmul.mubr.msk.f32.vlgmr.msra.gmra.mrb[2].mxu0 %vm544_vm0, %v708_v22 }
 0x123   : > { %2027 = vmatprep.mubr.msk.f32.mxu0 %vm2585_vm1, %v2584_v1 }
 0x1ec   : > { %v614_v23 = vpop.f32.mrb[0].mxu0 }
 0x1ed   : > { %618 = vst.msk [vmem:[#allocation2] sm:$0xff] %vm544_vm0, %v614_v23  ;;  %v1982_v24 = vpop.f32.mrb[1].mxu0  ;;  %v704_v25 = vpop.f32.mrb[0].mxu1 }
 0x1ee   : > { %v1993_v26 = vpop.f32.mrb[1].mxu1  ;;  %976 = vrot.lane.b32.xlu1 %v704_v25, %s2586_s15  ;;  %2006 = vmatpush3.xpose.msk.msra.mxu1 %vm788_vm2, %v704_v25 }
 0x1ef   : > { %2010 = vmatprep.subr.mxu1 %v2584_v1 }
 0x1f4   : > { %v972_v27 = vld [vmem:[#allocation2] sm:$0xff] }
 0x1f5   : > { %974 = vrot.lane.b32.xlu1 %v972_v27, %s2586_s15  ;;  %2008 = vmatmul.mubr.msk.f32.vlgmr.msra.gmra.mrb[2].mxu1 %vm788_vm2, %v972_v27  ;;  %v3058_v34 = vpop.f32.mrb[2].mxu0 }
 0x1f6   : > { %2012 = vmatprep.mubr.msk.f32.mxu1 %vm2585_vm1, %v2584_v1  ;;  %v2004_v35 = vpop.f32.mrb[3].mxu0  ;;  %2011 = vmatpush3.msra.mxu1 %v3058_v34 }
 0x1f7   : > { %2015 = vmatprep.subr.mxu1 %v2584_v1 }
 0x1f9   : > { %1173 = vrot.lane.b32.xlu1 %v704_v25, %s2587_s17 }
 0x1fd   : > { %1171 = vrot.lane.b32.xlu1 %v972_v27, %s2587_s17 }
 0x201   : > { %1369 = vrot.lane.b32.xlu1 %v704_v25, %s2588_s26 }
 0x205   : > { %1367 = vrot.lane.b32.xlu1 %v972_v27, %s2588_s26 }
 0x260   : > { %v977_v28 = vpop.permute.xlu1 %976 }
 0x267   : > { %v975_v29 = vpop.permute.xlu1 %974 }
 0x26b   : > { %v1174_v30 = vpop.permute.xlu1 %1173 }
 0x26c   : > { %2026 = vmatpush3.xpose.msk.msra.mxu0 %vm788_vm2, %v1174_v30 }
 0x26d   : > { %2035 = vmatprep.subr.mxu0 %v2584_v1 }
 0x26f   : > { %v1172_v31 = vpop.permute.xlu1 %1171 }
 0x270   : > { %2028 = vmatmul.mubr.msk.f32.vlgmr.msra.gmra.mrb[4].mxu0 %vm788_vm2, %v1172_v31 }
 0x271   : > { %2037 = vmatprep.mubr.msk.f32.mxu0 %vm2585_vm1, %v2584_v1 }
 0x273   : > { %v1370_v32 = vpop.permute.xlu1 %1369 }
 0x274   : > { %2036 = vmatpush3.xpose.msk.msra.mxu0 %vm788_vm2, %v1370_v32 }
 0x275   : > { %2074 = vmatprep.subr.bf16.mxu0 %v2583_v0 }
 0x277   : > { %v1368_v33 = vpop.permute.xlu1 %1367 }
 0x278   : > { %2038 = vmatmul.mubr.msk.f32.vlgmr.msra.gmra.mrb[6].mxu0 %vm788_vm2, %v1368_v33 }
 0x279   : > { %2053 = vmatprep.mubr.msk.f32.mxu0 %vm2585_vm1, %v2584_v1 }
 0x2c8   : > { %v861_v37 = vpop.f32.mrb[2].mxu1 }
 0x2c9   : > { %v862_v38 = vadd.f32 %v861_v37, %v786_v36  ;;  %v2009_v39 = vpop.f32.mrb[3].mxu1 }
 0x2cb   : > { %v866_v40 = vsel %vm788_vm2, %v862_v38, -inf }
 0x2cc   : > { %867 = vmax.xlane.f32.xlu0 %v866_v40 }
 0x343   : > { %v1245_v43 = vpop.f32.mrb[4].mxu0 }
 0x344   : > { %v2029_v44 = vpop.f32.mrb[5].mxu0  ;;  %v1246_v51 = vadd.f32 %v1245_v43, %v786_v36 }
 0x346   : > { %v1251_v52 = vsel %vm788_vm2, %v1246_v51, -inf }
 0x34b   : > { %v1441_v45 = vpop.f32.mrb[6].mxu0 }
 0x34c   : > { %v2039_v46 = vpop.f32.mrb[7].mxu0  ;;  %v1442_v4 = vadd.f32 %v1441_v45, %v786_v36 }
 0x34e   : > { %v1447_v6 = vsel %vm788_vm2, %v1442_v4, -inf }
 0x359   : > { %v868_v48 = vpop.xlane.xlu0 %867 }
 0x35a   : > { %v3080_v49 = vmax.f32 %v3077_v47, %v868_v48 }
 0x35c   : > { %v870_v50 = vsub.f32 %v3077_v47, %v3080_v49  ;;  %971 = vst.msk [vmem:[#allocation3] sm:$0xff] %vm619_vm3, %v3080_v49  ;;  %875 = vperm.xlu0 %2211, %v3080_v49   ;;  %v1070_v47 = vld [vmem:[#allocation4 + $0x8] sm:$0xff] }
 0x35e   : > { %v871_v35 = vmul.f32 1.442695, %v870_v50  ;;  %v1267_v50 = vld [vmem:[#allocation4 + $0x10] sm:$0xff] }
 0x37b   : > { %1252 = vmax.xlane.f32.xlu0 %v1251_v52 }
 0x3db   : > { %v876_v53 = vpop.permute.xlu0 %875 }
 0x3dc   : > { %v878_v54 = vsub.f32 %v862_v38, %v876_v53 }
 0x3de   : > { %v879_v55 = vmul.f32 1.442695, %v878_v54  ;;  %v1463_v54 = vld [vmem:[#allocation4 + $0x18] sm:$0xff] }
 0x3e0   : > { %2213 = vpow2.f32 %v879_v55 }
 0x3ea   : > { %v2214_v56 = vpop.eup %2213 }
 0x3eb   : > { %2013 = vmatmul.mubr.msk.f32.vlgmr.msra.gmra.mrb[4].mxu1 %vm788_vm2, %v2214_v56  ;;  %v883_v15 = vsel %vm788_vm2, %v2214_v56, 0.0 }
 0x3ec   : > { %2016 = vmatpush3.xpose.msk.msra.mxu1 %vm788_vm2, %v977_v28  ;;  %2017 = vmatprep.mubr.msk.f32.mxu1 %vm2585_vm1, %v2584_v1 }
 0x3ed   : > { %2020 = vmatprep.subr.mxu1 %v2584_v1 }
 0x3ef   : > { %2018 = vmatmul.mubr.msk.f32.vlgmr.msra.gmra.mrb[6].mxu1 %vm788_vm2, %v975_v29 }
 0x3f0   : > { %2022 = vmatprep.mubr.msk.f32.mxu1 %vm2585_vm1, %v2584_v1 }
 0x408   : > { %v1253_v58 = vpop.xlane.xlu0 %1252 }
 0x409   : > { %v3099_v59 = vmax.f32 %v3096_v57, %v1253_v58 }
 0x40b   : > { %v1255_v60 = vsub.f32 %v3096_v57, %v3099_v59  ;;  %1364 = vst.msk [vmem:[#allocation3 + $0x10] sm:$0xff] %vm619_vm3, %v3099_v59  ;;  %1260 = vperm.xlu0 %2211, %v3099_v59   ;;  %v889_v59 = vld [vmem:[#allocation5] sm:$0xff] }
 0x48a   : > { %v1261_v16 = vpop.permute.xlu0 %1260 }
 0x48b   : > { %v1263_v17 = vsub.f32 %v1246_v51, %v1261_v16  ;;  %v1607_v16 = vld [vmem:[#allocation18 + $0x10] sm:$0xff] }
 0x48d   : > { %v1264_v20 = vmul.f32 1.442695, %v1263_v17  ;;  %v1608_v17 = vld [vmem:[#allocation18 + $0x18] sm:$0xff] }
 0x4be   : > { %v3106_v61 = vpop.f32.mrb[4].mxu1 }
 0x4bf   : > { %v2014_v62 = vpop.f32.mrb[5].mxu1 }
 0x4c2   : > { %v1048_v63 = vpop.f32.mrb[6].mxu1 }
 0x4c3   : > { %v1049_v2 = vadd.f32 %v1048_v63, %v786_v36  ;;  %v2019_v3 = vpop.f32.mrb[7].mxu1  ;;  %v1256_v36 = vmul.f32 1.442695, %v1255_v60 }
 0x4c5   : > { %v1054_v5 = vsel %vm788_vm2, %v1049_v2, -inf }
 0x4c6   : > { %1055 = vmax.xlane.f32.xlu1 %v1054_v5 }
 0x4ca   : > { %1448 = vmax.xlane.f32.xlu1 %v1447_v6 }
 0x553   : > { %v1056_v8 = vpop.xlane.xlu1 %1055 }
 0x554   : > { %v1057_v9 = vmax.f32 %v1053_v7, %v1056_v8 }
 0x556   : > { %v1058_v11 = vsub.f32 %v1053_v7, %v1057_v9  ;;  %1168 = vst.msk [vmem:[#allocation3 + $0x8] sm:$0xff] %vm619_vm3, %v1057_v9  ;;  %1063 = vperm.xlu1 %2212, %v1057_v9  }
 0x557   : > { %v1449_v12 = vpop.xlane.xlu1 %1448 }
 0x558   : > { %v1450_v13 = vmax.f32 %v1446_v10, %v1449_v12 }
 0x55a   : > { %v1451_v14 = vsub.f32 %v1446_v10, %v1450_v13  ;;  %1560 = vst.msk [vmem:[#allocation3 + $0x18] sm:$0xff] %vm619_vm3, %v1450_v13  ;;  %1085 = vrot.lane.b32.xlu1 %v3058_v34, %s2586_s15  ;;  %s2475_s15 = scalar_lea.vmem %s2474_s30, 256 }
 0x55b   : > { %p2477_p7 = scmp.lt.s32.totalorder %s2475_s15, %s2469_s24 }
 0x55c   : > { %v1452_v37 = vmul.f32 1.442695, %v1451_v14  ;;  %v1606_v14 = vld [vmem:[#allocation18 + $0x8] sm:$0xff] }
 0x55d   : > { %p2478_p10 = por %p2477_p7, %p2476_p5 }
 0x55e   : > { %1456 = vperm.xlu1 %2212, %v1450_v13   ;;  %v1605_v13 = vld [vmem:[#allocation18] sm:$0xff] }
 0x55f   : > { %p2479_p6 = pnand %p2478_p10, %p2472_p9 }
 0x562   : > { %1281 = vrot.lane.b32.xlu1 %v3058_v34, %s2587_s17 }
 0x566   : > { %1477 = vrot.lane.b32.xlu1 %v3058_v34, %s2588_s26  ;;  %v1059_v34 = vmul.f32 1.442695, %v1058_v11 }
 0x58a   : > { %884 = vadd.xlane.f32.xlu1 %v883_v15  ;;  %v2075_v15 = vpack.c.bf16 %v1606_v14, %v1605_v13 }
 0x58c   : > { %2076 = vmatpush3.bf16.msra.mxu0 %v2075_v15 }
 0x58d   : > { %2077 = vmatprep.subr.bf16.mxu0 %v2583_v0 }
 0x5d5   : > { %v1064_v18 = vpop.permute.xlu1 %1063 }
 0x5d6   : > { %v1066_v19 = vsub.f32 %v1049_v2, %v1064_v18  ;;  %v2078_v18 = vpack.c.bf16 %v1608_v17, %v1607_v16 }
 0x5d8   : > { %v1067_v21 = vmul.f32 1.442695, %v1066_v19  ;;  %2079 = vmatpush3.bf16.msra.mxu0 %v2078_v18 }
 0x5d9   : > { %v1086_v22 = vpop.permute.xlu1 %1085 }
 0x5da   : > { %2215 = vpow2.f32 %v1067_v21  ;;  %2021 = vmatpush3.msra.mxu1 %v1086_v22 }
 0x5db   : > { %2030 = vmatprep.subr.mxu1 %v2584_v1  ;;  %2217 = vpow2.f32 %v1264_v20 }
 0x5dd   : > { %v1457_v23 = vpop.permute.xlu1 %1456 }
 0x5de   : > { %v1459_v24 = vsub.f32 %v1442_v4, %v1457_v23 }
 0x5e0   : > { %v1460_v25 = vmul.f32 1.442695, %v1459_v24 }
 0x5e1   : > { %v1282_v26 = vpop.permute.xlu1 %1281 }
 0x5e2   : > { %2219 = vpow2.f32 %v1460_v25 }
 0x5e3   : > { %2221 = vpow2.f32 %v1059_v34 }
 0x5e4   : > { %v2216_v27 = vpop.eup %2215  ;;  %2223 = vpow2.f32 %v871_v35 }
 0x5e5   : > { %2023 = vmatmul.mubr.msk.f32.vlgmr.msra.gmra.mrb[8].mxu1 %vm788_vm2, %v2216_v27  ;;  %v1072_v28 = vsel %vm788_vm2, %v2216_v27, 0.0  ;;  %v2218_v29 = vpop.eup %2217  ;;  %v1478_v30 = vpop.permute.xlu1 %1477  ;;  %2225 = vpow2.f32 %v1256_v36 }
 0x5e6   : > { %2031 = vmatpush3.msra.mxu1 %v1282_v26  ;;  %1073 = vadd.xlane.f32.xlu0 %v1072_v28  ;;  %v1269_v31 = vsel %vm788_vm2, %v2218_v29, 0.0  ;;  %2227 = vpow2.f32 %v1452_v37 }
 0x5e7   : > { %2032 = vmatprep.mubr.msk.f32.mxu1 %vm2585_vm1, %v2584_v1  ;;  %2040 = vmatprep.subr.mxu1 %v2584_v1 }
 0x5e9   : > { %2033 = vmatmul.mubr.msk.f32.vlgmr.msra.gmra.mrb[10].mxu1 %vm788_vm2, %v2218_v29 }
 0x5ea   : > { %2041 = vmatpush3.msra.mxu1 %v1478_v30  ;;  %1270 = vadd.xlane.f32.xlu0 %v1269_v31 }
 0x5eb   : > { %2042 = vmatprep.mubr.msk.f32.mxu1 %vm2585_vm1, %v2584_v1 }
 0x5ec   : > { %v2220_v32 = vpop.eup %2219 }
 0x5ed   : > { %2043 = vmatmul.mubr.msk.f32.vlgmr.msra.gmra.mrb[12].mxu1 %vm788_vm2, %v2220_v32  ;;  %v1465_v33 = vsel %vm788_vm2, %v2220_v32, 0.0  ;;  %v2222_v1 = vpop.eup %2221 }
 0x5ee   : > { %1466 = vadd.xlane.f32.xlu1 %v1465_v33  ;;  %v2224_v38 = vpop.eup %2223  ;;  %v1071_v48 = vmul.f32 %v2222_v1, %v1070_v47 }
 0x5ef   : > { %v2226_v39 = vpop.eup %2225  ;;  %v882_v42 = vmul.f32 %v2224_v38, %v881_v41 }
 0x5f0   : > { %v2228_v40 = vpop.eup %2227  ;;  %v1268_v52 = vmul.f32 %v2226_v39, %v1267_v50 }
 0x5f1   : > { %v1464_v56 = vmul.f32 %v2228_v40, %v1463_v54 }
 0x5ff   : > { %1080 = vperm.xlu1 %2212, %v2222_v1  }
 0x600   : > { %892 = vperm.xlu0 %2211, %v2224_v38  }
 0x604   : > { %1277 = vperm.xlu0 %2211, %v2226_v39  }
 0x608   : > { %1473 = vperm.xlu0 %2211, %v2228_v40  }
 0x617   : > { %v885_v43 = vpop.xlane.xlu1 %884 }
 0x618   : > { %v886_v44 = vadd.f32 %v885_v43, %v882_v42 }
 0x61a   : > { %888 = vst.msk [vmem:[#allocation4] sm:$0xff] %vm619_vm3, %v886_v44 }
 0x621   : > { %v1565_v45 = vld [vmem:[#allocation4] sm:$0xff] }
 0x622   : > { %2229 = vrcp.f32 %v1565_v45  ;;  %v1930_v45 = vld [vmem:[%s3286_s12] ss:$0 sm:$0xff] }
 0x62c   : > { %v2230_v46 = vpop.eup %2229 }
 0x62d   : > { %1569 = vperm.xlu0 %2211, %v2230_v46  }
 0x673   : > { %v1074_v49 = vpop.xlane.xlu0 %1073 }
 0x674   : > { %v1075_v51 = vadd.f32 %v1074_v49, %v1071_v48 }
 0x676   : > { %1076 = vst.msk [vmem:[#allocation4 + $0x8] sm:$0xff] %vm619_vm3, %v1075_v51 }
 0x677   : > { %v1271_v53 = vpop.xlane.xlu0 %1270 }
 0x678   : > { %v1272_v55 = vadd.f32 %v1271_v53, %v1268_v52 }
 0x67a   : > { %1273 = vst.msk [vmem:[#allocation4 + $0x10] sm:$0xff] %vm619_vm3, %v1272_v55 }
 0x67b   : > { %v1467_v57 = vpop.xlane.xlu1 %1466 }
 0x67c   : > { %v1468_v58 = vadd.f32 %v1467_v57, %v1464_v56 }
 0x67d   : > { %v1575_v4 = vld [vmem:[#allocation4 + $0x8] sm:$0xff] }
 0x67e   : > { %1469 = vst.msk [vmem:[#allocation4 + $0x18] sm:$0xff] %vm619_vm3, %v1468_v58 }
 0x67f   : > { %v893_v60 = vpop.permute.xlu0 %892  ;;  %v1081_v20 = vpop.permute.xlu1 %1080 }
 0x680   : > { %v895_v62 = vmul.f32 %v893_v60, %v889_v59 }
 0x681   : > { %v1585_v63 = vld [vmem:[#allocation4 + $0x10] sm:$0xff] }
 0x682   : > { %v969_v2 = vadd.f32 %v3106_v61, %v895_v62  ;;  %2231 = vrcp.f32 %v1585_v63 }
 0x683   : > { %2233 = vrcp.f32 %v1575_v4  ;;  %v1278_v24 = vpop.permute.xlu0 %1277 }
 0x684   : > { %970 = vst.msk [vmem:[#allocation5] sm:$0xff] %vm788_vm2, %v969_v2 }
 0x685   : > { %v1595_v7 = vld [vmem:[#allocation4 + $0x18] sm:$0xff] }
 0x686   : > { %2235 = vrcp.f32 %v1595_v7 }
 0x687   : > { %v1474_v29 = vpop.permute.xlu0 %1473 }
 0x68b   : > { %v1077_v19 = vld [vmem:[#allocation5] sm:$0xff] }
 0x68c   : > { %v2232_v3 = vpop.eup %2231  ;;  %v1083_v21 = vmul.f32 %v1081_v20, %v1077_v19 }
 0x68d   : > { %1589 = vperm.xlu0 %2211, %v2232_v3   ;;  %v2234_v11 = vpop.eup %2233 }
 0x690   : > { %v2236_v12 = vpop.eup %2235 }
 0x6ac   : > { %v1570_v33 = vpop.permute.xlu0 %1569 }
 0x6b8   : > { %v1157_v5 = vpop.f32.mrb[8].mxu1 }
 0x6b9   : > { %v2024_v6 = vpop.f32.mrb[9].mxu1  ;;  %1162 = vrot.lane.b32.xlu1 %v1157_v5, %s2591_s9 }
 0x6bc   : > { %v1353_v8 = vpop.f32.mrb[10].mxu1 }
 0x6bd   : > { %1358 = vrot.lane.b32.xlu1 %v1353_v8, %s2592_s4  ;;  %v2034_v9 = vpop.f32.mrb[11].mxu1 }
 0x6c0   : > { %v1549_v10 = vpop.f32.mrb[12].mxu1 }
 0x6c1   : > { %1554 = vrot.lane.b32.xlu1 %v1549_v10, %s2593_s27  ;;  %v2044_v61 = vpop.f32.mrb[13].mxu1 }
 0x6c5   : > { %1579 = vperm.xlu1 %2212, %v2234_v11  }
 0x6c9   : > { %1599 = vperm.xlu1 %2212, %v2236_v12  }
 0x70c   : > { %v1590_v38 = vpop.permute.xlu0 %1589 }
 0x72b   : > { %v1163_v22 = vpop.permute.xlu1 %1162 }
 0x72c   : > { %v1165_v23 = vadd.f32 %v1163_v22, %v1083_v21 }
 0x72e   : > { %1167 = vst.msk [vmem:[#allocation5] sm:$0xff] %vm1166_vm4, %v1165_v23 }
 0x72f   : > { %v1359_v27 = vpop.permute.xlu1 %1358 }
 0x733   : > { %v1555_v31 = vpop.permute.xlu1 %1554 }
 0x735   : > { %v1274_v25 = vld [vmem:[#allocation5] sm:$0xff] }
 0x736   : > { %v1280_v26 = vmul.f32 %v1278_v24, %v1274_v25 }
 0x738   : > { %v1361_v28 = vadd.f32 %v1359_v27, %v1280_v26 }
 0x73a   : > { %1363 = vst.msk [vmem:[#allocation5] sm:$0xff] %vm1362_vm5, %v1361_v28 }
 0x741   : > { %v1470_v30 = vld [vmem:[#allocation5] sm:$0xff] }
 0x742   : > { %v1476_v0 = vmul.f32 %v1474_v29, %v1470_v30 }
 0x744   : > { %v1557_v32 = vadd.f32 %v1555_v31, %v1476_v0  ;;  %v1580_v37 = vpop.permute.xlu1 %1579 }
 0x746   : > { %1559 = vst.msk [vmem:[#allocation5] sm:$0xff] %vm1558_vm6, %v1557_v32 }
 0x748   : > { %v1600_v42 = vpop.permute.xlu1 %1599 }
 0x74d   : > { %v1564_v34 = vld [vmem:[#allocation5] sm:$0xff] }
 0x74e   : > { %v1572_v35 = vmul.f32 %v1570_v33, %v1564_v34 }
 0x750   : > { %1573 = vst.msk [vmem:[#allocation5] sm:$0xff] %vm788_vm2, %v1572_v35 }
 0x757   : > { %v1574_v36 = vld [vmem:[#allocation5] sm:$0xff] }
 0x758   : > { %v1582_v1 = vmul.f32 %v1580_v37, %v1574_v36 }
 0x75a   : > { %1583 = vst.msk [vmem:[#allocation5] sm:$0xff] %vm1166_vm4, %v1582_v1 }
 0x761   : > { %v1584_v39 = vld [vmem:[#allocation5] sm:$0xff] }
 0x762   : > { %v1592_v40 = vmul.f32 %v1590_v38, %v1584_v39 }
 0x764   : > { %1593 = vst.msk [vmem:[#allocation5] sm:$0xff] %vm1362_vm5, %v1592_v40 }
 0x76b   : > { %v1594_v41 = vld [vmem:[#allocation5] sm:$0xff] }
 0x76c   : > { %v1602_v43 = vmul.f32 %v1600_v42, %v1594_v41 }
 0x76e   : > { %1603 = vst.msk [vmem:[#allocation5] sm:$0xff] %vm1558_vm6, %v1602_v43 }
 0x775   : > { %v1604_v44 = vld [vmem:[#allocation5] sm:$0xff] }
 0x776   : > { %2054 = vmatmul.mubr.msk.f32.vlgmr.msra.gmra.mrb[8].mxu0 %vm544_vm0, %v1604_v44 }
 0x849   : > { %v1685_v46 = vpop.f32.mrb[8].mxu0 }
 0x84a   : > { %v1686_v47 = vadd.f32 %v1930_v45, %v1685_v46  ;;  %v2055_v48 = vpop.f32.mrb[9].mxu0 }
 0x84c   : > { %1689 = vst.msk [vmem:[%s534_s16] sm:$0xff] %vm544_vm0, %v1686_v47 }
 0x84d   : > { %2482 = shalt.err (!%p2479_p6)
}
 0x84e   : > { %s2483_s18 = scalar_lea.hbm %s3160_s1, 128  ;;  %s2487_s9 = scalar_lea.hbm %s3287_s25, 256 }
 0x84f   : > { %p2484_p2 = scmp.ne.s32.totalorder %s3160_s1, %s2483_s18  ;;  %p2488_p1 = scmp.lt.u32.totalorder %s3160_s1, %s3287_s25 }
 0x850   : > { %p2489_p4 = scmp.lt.u32.totalorder %s2487_s9, %s2483_s18  ;;  %p2491_p3 = scmp.lt.u32.totalorder %s2483_s18, %s3160_s1 }
 0x851   : > { %p2485_p11 = pnand %p2484_p2, %p3288_p0 }
 0x852   : > { %p2490_p13 = por %p2489_p4, %p2488_p1 }
 0x853   : > { %p2486_p8 = pneg %p2485_p11 }
 0x854   : > { %p2492_p12 = por %p2491_p3, %p2490_p13 }
 0x856   : > { %p2493_p9 = pnand %p2492_p12, %p2486_p8 }
 0x858   : > { %2496 = shalt.err (!%p2493_p9)
}
 0x859   : > { %2104 = dma.vmem_to_hbm [thread:$0]  (%p3288_p0), %s3162_s22, 128, %s3160_s1, %s1691_s5  }
 0x85a PF: > { %s3289_s21 = sld [smem:[#allocation28_spill]]  ;;  %s3290_s13 = sld [smem:[#allocation31_spill]] }
 0x85b   : > { %p3292_p7 = scmp.ge.s32.totalorder %s2571_s14, 2 }
 0x860   : > { %s1716_s20 = sand.u32 1, %s3289_s21   ;;  %p3291_p5 = scmp.ne.s32.totalorder %s3290_s13, 0 }
 0x861   : > { %s1717_s12 = scalar_lea.sflag [#allocation8], %s1716_s20 }
 0x862   : > { %p2133_p10 = pnand %p3292_p7, %p3291_p5 }
 0x864   : > { %2546 = dma.done.wait (!%p2133_p10), %s1717_s12, 128  }
 0x865   : > { %2548 = vsyncadd (!%p2133_p10), %s1717_s12, 4294967168  ;;  %s33_s14 = sadd.s32 1, %s2571_s14   ;;  %s3293_s23 = sld [smem:[#allocation34_spill]] }
 0x866   : > { %p30_p6 = scmp.ge.s32.totalorder %s33_s14, 4   ;;  %s3294_s12 = sld [smem:[#allocation30_spill]] }
 0x867   : > { %s3295_s13 = sld [smem:[#allocation32_spill]]  ;;  %s3296_s30 = smov %s2555_s10 }
 0x868   : > { %s3297_s10 = smov %s2559_s11  ;;  %32 = sbr.rel (!%p30_p6) target bundleno = 18 (0x12), region = 168 }
 0x86b   : > { %s3298_s11 = smov %s3293_s23 }
 0x86f   :  { %1722 = vsyncpa [#allocation7], 1 }
 0x870   :  { %1724 = vsyncpa [#allocation7 + $0x1], 1 }
 0x871   :  { %1725 = vsyncpa [#allocation10], 1 }
 0x872   :  { %1727 = vsyncpa [#allocation10 + $0x1], 1 }
 0x873   :  { %1728 = vsyncpa [#allocation13], 1 }
 0x874   :  { %1730 = vsyncpa [#allocation13 + $0x1], 1 }
 0x875   :  { %1731 = vsyncpa [#allocation16], 1 }
 0x876   :  { %1732 = vsyncpa [#allocation19], 1 }
 0x877   :  { %1733 = vsyncpa [#allocation8], 1 }
 0x878   :  { %1735 = vsyncpa [#allocation8 + $0x1], 1 }

</bundles_post_ra>
